<compile_context>
chip_gen: v6e
topology: v6e:2x2x1
jax: 0.10.0
libtpu: 0.0.40
codegen_flags: <defaults>
</compile_context>

<pallas_src>
import functools

import jax
import jax.numpy as jnp
from jax.experimental import pallas as pl
from jax.experimental.pallas import tpu as pltpu

# ---- "small" configuration consistent with the module ----------------------
LATENT_DIM = 16           # module default is 100; small for the example
NUM_CLASSES = 3
IMG_SHAPE = (3, 16, 16)   # module default is (3, 128, 128); small for the example
IMG_DIM = IMG_SHAPE[0] * IMG_SHAPE[1] * IMG_SHAPE[2]       # 768
BN_EPS = 0.8              # nn.BatchNorm1d(n, 0.8) -> eps = 0.8 (2nd positional arg)

H1, H2, H3 = 128, 256, 512
K_IN = LATENT_DIM + NUM_CLASSES                            # 19
K_PAD = ((K_IN + 127) // 128) * 128                        # lane-aligned (works for latent_dim=100 too)

VMEM_LIMIT_BYTES = 32 * 1024 * 1024   # safe on v5e/v6e/v7x; covers TN<=2048 double-buffered tiles
_FUSED_W4_BYTES_MAX = 8 * 1024 * 1024  # below this, keep w4 fully resident (fast path)
_MAX_TN = 2048                         # review: 1-2K tiles; bounded by vreg/VMEM budgets


# ---------------------------------------------------------------------------
# Shared math: layers 1..3 (Linear+ReLU, Linear+BN+ReLU, Linear+BN+ReLU)
# ---------------------------------------------------------------------------
def _mlp_trunk(x, w1, b1, w2, b2, g2, be2, w3, b3, g3, be3):
    """bf16 (B, K_PAD) input -> bf16 (B, H3) hidden state, f32 accumulation."""
    h = jnp.dot(x, w1, preferred_element_type=jnp.float32) + b1
    h = jnp.maximum(h, 0.0)

    h = jnp.dot(h.astype(jnp.bfloat16), w2, preferred_element_type=jnp.float32) + b2
    mean = jnp.mean(h, axis=0, keepdims=True)
    # E[x^2]-mean^2 form is fine here only because eps=0.8 dwarfs rounding error.
    var = jnp.mean(h * h, axis=0, keepdims=True) - mean * mean
    scale = g2 * jax.lax.rsqrt(var + BN_EPS)
    h = jnp.maximum(h * scale + (be2 - mean * scale), 0.0)

    h = jnp.dot(h.astype(jnp.bfloat16), w3, preferred_element_type=jnp.float32) + b3
    mean = jnp.mean(h, axis=0, keepdims=True)
    var = jnp.mean(h * h, axis=0, keepdims=True) - mean * mean
    scale = g3 * jax.lax.rsqrt(var + BN_EPS)
    h = jnp.maximum(h * scale + (be3 - mean * scale), 0.0)

    return h.astype(jnp.bfloat16)


# ---------------------------------------------------------------------------
# Kernels
# ---------------------------------------------------------------------------
def _fused_kernel(x_ref, w1_ref, b1_ref, w2_ref, b2_ref, g2_ref, be2_ref,
                  w3_ref, b3_ref, g3_ref, be3_ref, w4_ref, b4_ref, out_ref):
    """Small-config fast path: whole forward, everything resident, no grid."""
    h3 = _mlp_trunk(x_ref[...],
                    w1_ref[...], b1_ref[...],
                    w2_ref[...], b2_ref[...], g2_ref[...], be2_ref[...],
                    w3_ref[...], b3_ref[...], g3_ref[...], be3_ref[...])
    h4 = jnp.dot(h3, w4_ref[...], preferred_element_type=jnp.float32) + b4_ref[...]
    out_ref[...] = jnp.tanh(h4).astype(out_ref.dtype)


def _trunk_kernel(x_ref, w1_ref, b1_ref, w2_ref, b2_ref, g2_ref, be2_ref,
                  w3_ref, b3_ref, g3_ref, be3_ref, h3_ref):
    """Layers 1..3 -> bf16 h3 (tiny, grid-less)."""
    h3_ref[...] = _mlp_trunk(x_ref[...],
                             w1_ref[...], b1_ref[...],
                             w2_ref[...], b2_ref[...], g2_ref[...], be2_ref[...],
                             w3_ref[...], b3_ref[...], g3_ref[...], be3_ref[...])


def _layer4_kernel(h3_ref, w4_ref, b4_ref, out_ref):
    """Layer 4 (Linear + Tanh), N-tiled over the output; w4/b4 streamed.

    The grid axis is independent per tile (h3 has a constant index map), so it
    is safe to mark 'parallel' and split across TensorCores.
    """
    h4 = jnp.dot(h3_ref[...], w4_ref[...], preferred_element_type=jnp.float32) + b4_ref[...]
    out_ref[...] = jnp.tanh(h4).astype(out_ref.dtype)


# ---------------------------------------------------------------------------
# Parameters
# ---------------------------------------------------------------------------
def init_params(key):
    """Deterministic synthetic f32 parameters (shapes match the PyTorch module)."""
    ks = jax.random.split(key, 10)
    scale = 0.05
    return {
        # nn.Embedding(num_classes, num_classes)
        "emb": jax.random.normal(ks[0], (NUM_CLASSES, NUM_CLASSES), jnp.float32),
        # Linear weights stored pre-transposed as (in, out); PyTorch stores (out, in).
        "w1": scale * jax.random.normal(ks[1], (K_IN, H1), jnp.float32),
        "b1": scale * jax.random.normal(ks[2], (1, H1), jnp.float32),
        "w2": scale * jax.random.normal(ks[3], (H1, H2), jnp.float32),
        "b2": scale * jax.random.normal(ks[4], (1, H2), jnp.float32),
        "g2": jnp.ones((1, H2), jnp.float32),    # BatchNorm1d default gamma
        "be2": jnp.zeros((1, H2), jnp.float32),  # BatchNorm1d default beta
        "w3": scale * jax.random.normal(ks[5], (H2, H3), jnp.float32),
        "b3": scale * jax.random.normal(ks[6], (1, H3), jnp.float32),
        "g3": jnp.ones((1, H3), jnp.float32),
        "be3": jnp.zeros((1, H3), jnp.float32),
        "w4": scale * jax.random.normal(ks[7], (H3, IMG_DIM), jnp.float32),
        "b4": scale * jax.random.normal(ks[8], (1, IMG_DIM), jnp.float32),
    }


def prepare_params(params):
    """Kernel-ready params: bf16 weights, w1 zero-padded to (K_PAD, H1)."""
    kp = dict(params)
    kp["w1"] = jnp.pad(params["w1"], ((0, K_PAD - K_IN), (0, 0))).astype(jnp.bfloat16)
    for name in ("w2", "w3", "w4"):
        kp[name] = params[name].astype(jnp.bfloat16)
    return kp


def _pick_tn(img_dim, max_tn=_MAX_TN):
    """Largest multiple of 128 that divides img_dim, capped at max_tn."""
    assert img_dim % 128 == 0, "IMG_DIM must be a multiple of 128"
    best = 128
    for t in range(128, min(img_dim, max_tn) + 1, 128):
        if img_dim % t == 0:
            best = t
    return best


# ---------------------------------------------------------------------------
# Forward
# ---------------------------------------------------------------------------
@functools.partial(jax.jit, static_argnames=("out_dtype", "force_stream", "tn"))
def generator_forward(kparams, noise, labels, *, out_dtype=jnp.bfloat16,
                      force_stream=False, tn=None):
    """Equivalent of Generator.forward(noise, labels); bf16 weights, bf16 output."""
    # Glue (fuses inside the jit): embedding lookup + concat + bf16 cast +
    # zero-pad the feature dim to the lane-aligned K_PAD.
    emb = jnp.take(kparams["emb"], labels, axis=0)                 # (B, num_classes)
    gen_input = jnp.concatenate([emb, noise], axis=-1).astype(jnp.bfloat16)
    gen_input = jnp.pad(gen_input, ((0, 0), (0, K_PAD - K_IN)))    # (B, K_PAD)
    batch = gen_input.shape[0]

    trunk_args = (gen_input,
                  kparams["w1"], kparams["b1"],
                  kparams["w2"], kparams["b2"], kparams["g2"], kparams["be2"],
                  kparams["w3"], kparams["b3"], kparams["g3"], kparams["be3"])

    out_bytes = jnp.dtype(out_dtype).itemsize
    trunk_flops = 2 * batch * (K_PAD * H1 + H1 * H2 + H2 * H3)
    l4_flops = 2 * batch * H3 * IMG_DIM
    w4_bytes = H3 * IMG_DIM * 2                                    # bf16
    small_bytes = (2 * (K_PAD * H1 + H1 * H2 + H2 * H3)            # bf16 small weights
                   + 4 * (H1 + 3 * H2 + 3 * H3)                    # f32 biases / BN params
                   + 2 * batch * K_PAD)                            # bf16 input

    if not force_stream and w4_bytes <= _FUSED_W4_BYTES_MAX:
        # --- Fast path: w4 is small, run the whole forward as one kernel. ---
        cost = pl.CostEstimate(
            flops=trunk_flops + l4_flops,
            transcendentals=batch * IMG_DIM + batch * (H2 + H3),
            bytes_accessed=small_bytes + w4_bytes + 4 * IMG_DIM
            + batch * IMG_DIM * out_bytes)
        flat = pl.pallas_call(
            _fused_kernel,
            out_shape=jax.ShapeDtypeStruct((batch, IMG_DIM), out_dtype),
            compiler_params=pltpu.CompilerParams(vmem_limit_bytes=VMEM_LIMIT_BYTES),
            cost_estimate=cost,
        )(*trunk_args, kparams["w4"], kparams["b4"])
    else:
        # --- Streamed path (module-default sizes): trunk kernel + parallel
        #     layer-4 kernel streaming w4/b4 in lane-dense N-tiles. ---
        if tn is None:
            tn = _pick_tn(IMG_DIM)
        n_tiles = IMG_DIM // tn

        h3 = pl.pallas_call(
            _trunk_kernel,
            out_shape=jax.ShapeDtypeStruct((batch, H3), jnp.bfloat16),
            compiler_params=pltpu.CompilerParams(vmem_limit_bytes=VMEM_LIMIT_BYTES),
            cost_estimate=pl.CostEstimate(
                flops=trunk_flops,
                transcendentals=batch * (H2 + H3),
                bytes_accessed=small_bytes + 2 * batch * H3),
        )(*trunk_args)

        cost4 = pl.CostEstimate(
            flops=l4_flops,
            transcendentals=batch * IMG_DIM,
            bytes_accessed=w4_bytes + 4 * IMG_DIM + 2 * batch * H3
            + batch * IMG_DIM * out_bytes)
        flat = pl.pallas_call(
            _layer4_kernel,
            out_shape=jax.ShapeDtypeStruct((batch, IMG_DIM), out_dtype),
            grid=(n_tiles,),
            in_specs=[
                pl.BlockSpec((batch, H3), lambda j: (0, 0)),   # h3: tiny, resident
                pl.BlockSpec((H3, tn), lambda j: (0, j)),      # w4: streamed N-tiles
                pl.BlockSpec((1, tn), lambda j: (0, j)),       # b4: streamed N-tiles
            ],
            out_specs=pl.BlockSpec((batch, tn), lambda j: (0, j)),
            compiler_params=pltpu.CompilerParams(
                dimension_semantics=("parallel",),             # safe: tiles independent
                vmem_limit_bytes=VMEM_LIMIT_BYTES),
            cost_estimate=cost4,
        )(h3, kparams["w4"], kparams["b4"])

    # img.view(B, *img_shape) — NCHW output, same element order as PyTorch.
    return flat.reshape(batch, *IMG_SHAPE)


# ---------------------------------------------------------------------------
# Pure-JAX f32 reference (PyTorch training-mode semantics)
# ---------------------------------------------------------------------------
def _reference_forward(params, noise, labels):
    emb = jnp.take(params["emb"], labels, axis=0)
    x = jnp.concatenate([emb, noise], axis=-1)

    h = jnp.maximum(x @ params["w1"] + params["b1"], 0.0)

    h = h @ params["w2"] + params["b2"]
    m = h.mean(0, keepdims=True)
    v = ((h - m) ** 2).mean(0, keepdims=True)
    h = jnp.maximum(params["g2"] * (h - m) / jnp.sqrt(v + BN_EPS) + params["be2"], 0.0)

    h = h @ params["w3"] + params["b3"]
    m = h.mean(0, keepdims=True)
    v = ((h - m) ** 2).mean(0, keepdims=True)
    h = jnp.maximum(params["g3"] * (h - m) / jnp.sqrt(v + BN_EPS) + params["be3"], 0.0)

    h = jnp.tanh(h @ params["w4"] + params["b4"])
    return h.reshape(h.shape[0], *IMG_SHAPE)


if __name__ == "__main__":
    key = jax.random.PRNGKey(0)
    k_params, k_noise, k_labels = jax.random.split(key, 3)

    batch = 8
    params = init_params(k_params)
    kparams = prepare_params(params)
    noise = jax.random.normal(k_noise, (batch, LATENT_DIM), jnp.float32)
    labels = jax.random.randint(k_labels, (batch,), 0, NUM_CLASSES, jnp.int32)

    ref = _reference_forward(params, noise, labels)

    # Default (small-config fast path): one fused grid-less kernel.
    img = jax.block_until_ready(generator_forward(kparams, noise, labels))
    assert img.shape == (batch, *IMG_SHAPE), img.shape
    err = float(jnp.max(jnp.abs(img.astype(jnp.float32) - ref)))
    assert jnp.allclose(img.astype(jnp.float32), ref, atol=3e-2, rtol=3e-2), \
        f"fused path mismatch, max|err|={err}"

    # Also exercise the streamed layer-4 path (the design used at the
    # module-default img_shape) by forcing a small N-tile -> grid=(3,).
    img_s = jax.block_until_ready(
        generator_forward(kparams, noise, labels, force_stream=True, tn=256))
    err_s = float(jnp.max(jnp.abs(img_s.astype(jnp.float32) - ref)))
    assert jnp.allclose(img_s.astype(jnp.float32), ref, atol=3e-2, rtol=3e-2), \
        f"streamed path mismatch, max|err|={err_s}"

    print("KERNEL_OK")
</pallas_src>

<mosaic_0001>
module attributes {stable_mosaic.version = 11 : i64} {
  func.func @_fused_kernel(%arg0: memref<8x128xbf16, #tpu.memory_space<vmem>>, %arg1: memref<128x128xbf16, #tpu.memory_space<vmem>>, %arg2: memref<1x128xf32, #tpu.memory_space<vmem>>, %arg3: memref<128x256xbf16, #tpu.memory_space<vmem>>, %arg4: memref<1x256xf32, #tpu.memory_space<vmem>>, %arg5: memref<1x256xf32, #tpu.memory_space<vmem>>, %arg6: memref<1x256xf32, #tpu.memory_space<vmem>>, %arg7: memref<256x512xbf16, #tpu.memory_space<vmem>>, %arg8: memref<1x512xf32, #tpu.memory_space<vmem>>, %arg9: memref<1x512xf32, #tpu.memory_space<vmem>>, %arg10: memref<1x512xf32, #tpu.memory_space<vmem>>, %arg11: memref<512x768xbf16, #tpu.memory_space<vmem>>, %arg12: memref<1x768xf32, #tpu.memory_space<vmem>>, %arg13: memref<8x768xbf16, #tpu.memory_space<vmem>>) attributes {dimension_semantics = [], scalar_prefetch = 0 : i64, scratch_operands = 0 : i64, tpu.core_type = #tpu.core_type<tc>} {
    %c0 = arith.constant 0 : index
    %c0_0 = arith.constant 0 : index
    %0 = vector.load %arg0[%c0, %c0_0] : memref<8x128xbf16, #tpu.memory_space<vmem>>, vector<8x128xbf16>
    %c0_1 = arith.constant 0 : index
    %c0_2 = arith.constant 0 : index
    %1 = vector.load %arg1[%c0_1, %c0_2] : memref<128x128xbf16, #tpu.memory_space<vmem>>, vector<128x128xbf16>
    %c0_3 = arith.constant 0 : index
    %c0_4 = arith.constant 0 : index
    %2 = vector.load %arg2[%c0_3, %c0_4] : memref<1x128xf32, #tpu.memory_space<vmem>>, vector<1x128xf32>
    %c0_5 = arith.constant 0 : index
    %c0_6 = arith.constant 0 : index
    %3 = vector.load %arg3[%c0_5, %c0_6] : memref<128x256xbf16, #tpu.memory_space<vmem>>, vector<128x256xbf16>
    %c0_7 = arith.constant 0 : index
    %c0_8 = arith.constant 0 : index
    %4 = vector.load %arg4[%c0_7, %c0_8] : memref<1x256xf32, #tpu.memory_space<vmem>>, vector<1x256xf32>
    %c0_9 = arith.constant 0 : index
    %c0_10 = arith.constant 0 : index
    %5 = vector.load %arg5[%c0_9, %c0_10] : memref<1x256xf32, #tpu.memory_space<vmem>>, vector<1x256xf32>
    %c0_11 = arith.constant 0 : index
    %c0_12 = arith.constant 0 : index
    %6 = vector.load %arg6[%c0_11, %c0_12] : memref<1x256xf32, #tpu.memory_space<vmem>>, vector<1x256xf32>
    %c0_13 = arith.constant 0 : index
    %c0_14 = arith.constant 0 : index
    %7 = vector.load %arg7[%c0_13, %c0_14] : memref<256x512xbf16, #tpu.memory_space<vmem>>, vector<256x512xbf16>
    %c0_15 = arith.constant 0 : index
    %c0_16 = arith.constant 0 : index
    %8 = vector.load %arg8[%c0_15, %c0_16] : memref<1x512xf32, #tpu.memory_space<vmem>>, vector<1x512xf32>
    %c0_17 = arith.constant 0 : index
    %c0_18 = arith.constant 0 : index
    %9 = vector.load %arg9[%c0_17, %c0_18] : memref<1x512xf32, #tpu.memory_space<vmem>>, vector<1x512xf32>
    %c0_19 = arith.constant 0 : index
    %c0_20 = arith.constant 0 : index
    %10 = vector.load %arg10[%c0_19, %c0_20] : memref<1x512xf32, #tpu.memory_space<vmem>>, vector<1x512xf32>
    %cst = arith.constant dense<0.000000e+00> : vector<8x128xf32>
    %11 = tpu.matmul %0, %1, %cst {dimension_numbers = #tpu.dot_dimension_numbers<[1], [0], [0], [1], [0, 0, 1, 1], [], []>} : vector<8x128xbf16>, vector<128x128xbf16>, vector<8x128xf32> -> vector<8x128xf32>
    %12 = vector.broadcast %2 : vector<1x128xf32> to vector<8x128xf32>
    %13 = arith.addf %11, %12 : vector<8x128xf32>
    %cst_21 = arith.constant 0.000000e+00 : f32
    %14 = vector.broadcast %cst_21 : f32 to vector<8x128xf32>
    %15 = arith.maximumf %13, %14 : vector<8x128xf32>
    %16 = arith.truncf %15 : vector<8x128xf32> to vector<8x128xbf16>
    %cst_22 = arith.constant dense<0.000000e+00> : vector<8x256xf32>
    %17 = tpu.matmul %16, %3, %cst_22 {dimension_numbers = #tpu.dot_dimension_numbers<[1], [0], [0], [1], [0, 0, 1, 1], [], []>} : vector<8x128xbf16>, vector<128x256xbf16>, vector<8x256xf32> -> vector<8x256xf32>
    %18 = vector.broadcast %4 : vector<1x256xf32> to vector<8x256xf32>
    %19 = arith.addf %17, %18 : vector<8x256xf32>
    %cst_23 = arith.constant dense<0.000000e+00> : vector<256xf32>
    %20 = vector.multi_reduction <add>, %19, %cst_23 [0] : vector<8x256xf32> to vector<256xf32>
    %21 = vector.shape_cast %20 : vector<256xf32> to vector<1x256xf32>
    %cst_24 = arith.constant 8.000000e+00 : f32
    %22 = vector.broadcast %cst_24 : f32 to vector<1x256xf32>
    %23 = arith.divf %21, %22 : vector<1x256xf32>
    %24 = arith.mulf %19, %19 : vector<8x256xf32>
    %cst_25 = arith.constant dense<0.000000e+00> : vector<256xf32>
    %25 = vector.multi_reduction <add>, %24, %cst_25 [0] : vector<8x256xf32> to vector<256xf32>
    %26 = vector.shape_cast %25 : vector<256xf32> to vector<1x256xf32>
    %cst_26 = arith.constant 8.000000e+00 : f32
    %27 = vector.broadcast %cst_26 : f32 to vector<1x256xf32>
    %28 = arith.divf %26, %27 : vector<1x256xf32>
    %29 = arith.mulf %23, %23 : vector<1x256xf32>
    %30 = arith.subf %28, %29 : vector<1x256xf32>
    %cst_27 = arith.constant 8.000000e-01 : f32
    %31 = vector.broadcast %cst_27 : f32 to vector<1x256xf32>
    %32 = arith.addf %30, %31 : vector<1x256xf32>
    %33 = math.rsqrt %32 : vector<1x256xf32>
    %34 = arith.mulf %5, %33 : vector<1x256xf32>
    %35 = vector.broadcast %34 : vector<1x256xf32> to vector<8x256xf32>
    %36 = arith.mulf %19, %35 : vector<8x256xf32>
    %37 = arith.mulf %23, %34 : vector<1x256xf32>
    %38 = arith.subf %6, %37 : vector<1x256xf32>
    %39 = vector.broadcast %38 : vector<1x256xf32> to vector<8x256xf32>
    %40 = arith.addf %36, %39 : vector<8x256xf32>
    %cst_28 = arith.constant 0.000000e+00 : f32
    %41 = vector.broadcast %cst_28 : f32 to vector<8x256xf32>
    %42 = arith.maximumf %40, %41 : vector<8x256xf32>
    %43 = arith.truncf %42 : vector<8x256xf32> to vector<8x256xbf16>
    %cst_29 = arith.constant dense<0.000000e+00> : vector<8x512xf32>
    %44 = tpu.matmul %43, %7, %cst_29 {dimension_numbers = #tpu.dot_dimension_numbers<[1], [0], [0], [1], [0, 0, 1, 1], [], []>} : vector<8x256xbf16>, vector<256x512xbf16>, vector<8x512xf32> -> vector<8x512xf32>
    %45 = vector.broadcast %8 : vector<1x512xf32> to vector<8x512xf32>
    %46 = arith.addf %44, %45 : vector<8x512xf32>
    %cst_30 = arith.constant dense<0.000000e+00> : vector<512xf32>
    %47 = vector.multi_reduction <add>, %46, %cst_30 [0] : vector<8x512xf32> to vector<512xf32>
    %48 = vector.shape_cast %47 : vector<512xf32> to vector<1x512xf32>
    %cst_31 = arith.constant 8.000000e+00 : f32
    %49 = vector.broadcast %cst_31 : f32 to vector<1x512xf32>
    %50 = arith.divf %48, %49 : vector<1x512xf32>
    %51 = arith.mulf %46, %46 : vector<8x512xf32>
    %cst_32 = arith.constant dense<0.000000e+00> : vector<512xf32>
    %52 = vector.multi_reduction <add>, %51, %cst_32 [0] : vector<8x512xf32> to vector<512xf32>
    %53 = vector.shape_cast %52 : vector<512xf32> to vector<1x512xf32>
    %cst_33 = arith.constant 8.000000e+00 : f32
    %54 = vector.broadcast %cst_33 : f32 to vector<1x512xf32>
    %55 = arith.divf %53, %54 : vector<1x512xf32>
    %56 = arith.mulf %50, %50 : vector<1x512xf32>
    %57 = arith.subf %55, %56 : vector<1x512xf32>
    %cst_34 = arith.constant 8.000000e-01 : f32
    %58 = vector.broadcast %cst_34 : f32 to vector<1x512xf32>
    %59 = arith.addf %57, %58 : vector<1x512xf32>
    %60 = math.rsqrt %59 : vector<1x512xf32>
    %61 = arith.mulf %9, %60 : vector<1x512xf32>
    %62 = vector.broadcast %61 : vector<1x512xf32> to vector<8x512xf32>
    %63 = arith.mulf %46, %62 : vector<8x512xf32>
    %64 = arith.mulf %50, %61 : vector<1x512xf32>
    %65 = arith.subf %10, %64 : vector<1x512xf32>
    %66 = vector.broadcast %65 : vector<1x512xf32> to vector<8x512xf32>
    %67 = arith.addf %63, %66 : vector<8x512xf32>
    %cst_35 = arith.constant 0.000000e+00 : f32
    %68 = vector.broadcast %cst_35 : f32 to vector<8x512xf32>
    %69 = arith.maximumf %67, %68 : vector<8x512xf32>
    %70 = arith.truncf %69 : vector<8x512xf32> to vector<8x512xbf16>
    %c0_36 = arith.constant 0 : index
    %c0_37 = arith.constant 0 : index
    %71 = vector.load %arg11[%c0_36, %c0_37] : memref<512x768xbf16, #tpu.memory_space<vmem>>, vector<512x768xbf16>
    %cst_38 = arith.constant dense<0.000000e+00> : vector<8x768xf32>
    %72 = tpu.matmul %70, %71, %cst_38 {dimension_numbers = #tpu.dot_dimension_numbers<[1], [0], [0], [1], [0, 0, 1, 1], [], []>} : vector<8x512xbf16>, vector<512x768xbf16>, vector<8x768xf32> -> vector<8x768xf32>
    %c0_39 = arith.constant 0 : index
    %c0_40 = arith.constant 0 : index
    %73 = vector.load %arg12[%c0_39, %c0_40] : memref<1x768xf32, #tpu.memory_space<vmem>>, vector<1x768xf32>
    %74 = vector.broadcast %73 : vector<1x768xf32> to vector<8x768xf32>
    %75 = arith.addf %72, %74 : vector<8x768xf32>
    %76 = math.tanh %75 : vector<8x768xf32>
    %77 = arith.truncf %76 : vector<8x768xf32> to vector<8x768xbf16>
    %c0_41 = arith.constant 0 : index
    %c0_42 = arith.constant 0 : index
    %78 = vector.load %arg13[%c0_41, %c0_42] : memref<8x768xbf16, #tpu.memory_space<vmem>>, vector<8x768xbf16>
    tpu.vector_store %arg13[%c0_41, %c0_42], %77 {strides = array<i32>} : memref<8x768xbf16, #tpu.memory_space<vmem>>, vector<8x768xbf16>,
    return
  }
}

</mosaic_0001>

<bundles_post_ra>
// kernel: generator_forward.1
= control target key start
LH: loop header
LB: loop body
LE: loop exit
PB: predicated region body
PF: predicated region fallthrough
CT: control target
= control target key end

     0   :  { %18 = vsyncpa [#allocation3], 0  ;;  %s3708_s0 = inlined_call_operand.vmem [shape: bf16[8,128], index: 0, kind: input, shape index: {}]   ;;  %s3709_s1 = inlined_call_operand.vmem [shape: bf16[128,128], index: 1, kind: input, shape index: {}]   ;;  %s3710_s2 = inlined_call_operand.vmem [shape: f32[1,128], index: 2, kind: input, shape index: {}]   ;;  %s3711_s3 = inlined_call_operand.hbm [shape: bf16[128,256], index: 3, kind: input, shape index: {}]   ;;  %s3712_s4 = inlined_call_operand.vmem [shape: f32[1,256], index: 4, kind: input, shape index: {}]   ;;  %s3713_s5 = inlined_call_operand.vmem [shape: f32[1,256], index: 5, kind: input, shape index: {}]   ;;  %s3714_s6 = inlined_call_operand.vmem [shape: f32[1,256], index: 6, kind: input, shape index: {}]   ;;  %s3715_s7 = inlined_call_operand.hbm [shape: bf16[256,512], index: 7, kind: input, shape index: {}]   ;;  %s3716_s8 = inlined_call_operand.vmem [shape: f32[1,512], index: 8, kind: input, shape index: {}]   ;;  %s3717_s9 = inlined_call_operand.vmem [shape: f32[1,512], index: 9, kind: input, shape index: {}]   ;;  %s3718_s10 = inlined_call_operand.vmem [shape: f32[1,512], index: 10, kind: input, shape index: {}]   ;;  %s3719_s11 = inlined_call_operand.hbm [shape: bf16[512,768], index: 11, kind: input, shape index: {}]   ;;  %s3720_s12 = inlined_call_operand.vmem [shape: f32[1,768], index: 12, kind: input, shape index: {}]   ;;  %s3721_s13 = inlined_call_operand.vmem [shape: bf16[8,768], index: 13, kind: output, shape index: {}]  }
   0x1   :  { %19 = vsyncpa [#allocation5], 0  ;;  %s3450_s25 = smov [#allocation4]  }
   0x2   :  { %s49_s26 = sshll.u32 %s3450_s25, 4  ;;  %s50_s26 = int_to_ptr.vmem [resolvable:$true] %s49_s26 }
   0x3   :  { %s3394_s27 = scalar_lea.vmem %s50_s26, 8192  ;;  %p3399_p1 = scmp.lt.s32.totalorder %s50_s26, %s50_s26 }
   0x4   :  { %p3395_p0 = scmp.ne.s32.totalorder %s50_s26, %s3394_s27  ;;  %p3400_p2 = scmp.lt.s32.totalorder %s3394_s27, %s3394_s27 }
   0x6   :  { %p3401_p3 = por %p3400_p2, %p3399_p1 }
   0x8   :  { %p3402_p4 = pnand %p3401_p3, %p3395_p0 }
   0xa   :  { %3405 = shalt.err (!%p3402_p4)
}
   0xb   :  { %s3451_s28 = smov 256   ;;  %s3452_s29 = smov 16  }
   0xc   :  { %55 = dma.hbm_to_vmem [thread:$0]  %s3715_s7, 8192, %s50_s26, [#allocation5], %s3451_s28, %s3451_s28, %s3452_s29  }
   0xd   :  { %s3453_s15 = smov [#allocation2]  }
   0xe   :  { %s31_s16 = sshll.u32 %s3453_s15, 4  ;;  %s32_s16 = int_to_ptr.vmem [resolvable:$true] %s31_s16 }
   0xf   :  { %s3414_s17 = scalar_lea.vmem %s32_s16, 2048  ;;  %p3419_p6 = scmp.lt.s32.totalorder %s32_s16, %s32_s16 }
  0x10   :  { %p3415_p5 = scmp.ne.s32.totalorder %s32_s16, %s3414_s17  ;;  %p3420_p7 = scmp.lt.s32.totalorder %s3414_s17, %s3414_s17 }
  0x12   :  { %p3421_p8 = por %p3420_p7, %p3419_p6 }
  0x14   :  { %p3422_p9 = pnand %p3421_p8, %p3415_p5 }
  0x16   :  { %3425 = shalt.err (!%p3422_p9)
}
  0x17   :  { %s3454_s18 = smov 128   ;;  %s3455_s19 = smov 8  }
  0x18   :  { %37 = dma.hbm_to_vmem [thread:$0]  %s3711_s3, 2048, %s32_s16, [#allocation3], %s3454_s18, %s3454_s18, %s3455_s19  }
  0x19   :  { %s3456_s22 = smov [#allocation6]  }
  0x1a   :  { %s67_s23 = sshll.u32 %s3456_s22, 4  ;;  %s68_s23 = int_to_ptr.vmem [resolvable:$true] %s67_s23 }
  0x1b   :  { %s3434_s7 = scalar_lea.vmem %s68_s23, 24576  ;;  %p3439_p11 = scmp.lt.s32.totalorder %s68_s23, %s68_s23 }
  0x1c   :  { %p3435_p10 = scmp.ne.s32.totalorder %s68_s23, %s3434_s7  ;;  %p3440_p12 = scmp.lt.s32.totalorder %s3434_s7, %s3434_s7 }
  0x1e   :  { %p3441_p13 = por %p3440_p12, %p3439_p11 }
  0x20   :  { %p3442_p0 = pnand %p3441_p13, %p3435_p10 }
  0x22   :  { %3445 = shalt.err (!%p3442_p0)
}
  0x23   :  { %s3457_s24 = smov 384   ;;  %s3458_s25 = smov 24  }
  0x24   :  { %73 = dma.hbm_to_vmem [thread:$0]  %s3719_s11, 24576, %s68_s23, [#allocation5], %s3457_s24, %s3457_s24, %s3458_s25  }
  0x25   :  { %3446 = dma.done.wait [#allocation3], 2048  }
  0x26   :  { %3447 = vsyncadd [#allocation3], 4294965248 }
  0x27   :  { %3448 = dma.done.wait [#allocation5], 32768  }
  0x28   :  { %3449 = vsyncadd [#allocation5], 4294934528  ;;  %v3459_v0 = vmov 0.0   ;;  %vm3460_vm0 = vmmov 0   ;;  %v2946_v1 = vld [vmem:[%s3709_s1 + $0x38] sm:$0xff]   ;;  %v2947_v2 = vld [vmem:[%s3709_s1 + $0x30] sm:$0xff]  }
  0x29   :  { %2913 = vmatprep.subr.bf16.mxu0 %v3459_v0  ;;  %2929 = vmatprep.mubr.msk.bf16.mxu0 %vm3460_vm0, %v3459_v0  ;;  %v2948_v3 = vld [vmem:[%s3709_s1 + $0x28] sm:$0xff]   ;;  %v2954_v4 = vld [vmem:[#allocation2 + $0x74] ss:$8 sps:$4 sm:$0xff]   ;;  %v2956_v5 = vld [vmem:[#allocation2 + $0x70] ss:$8 sps:$4 sm:$0xff]   ;;  %v3461_v26 = vmov 0  }
  0x2a   :  { %2914 = vmatpush3.bf16.msra.mxu0 %v2946_v1  ;;  %v2949_v6 = vld [vmem:[%s3709_s1 + $0x20] sm:$0xff]   ;;  %377 = vmatprep.subr.bf16.mxu1 %v2954_v4  ;;  %v2960_v9 = vld [vmem:[#allocation2 + $0x54] ss:$8 sps:$4 sm:$0xff]   ;;  %v2962_v11 = vld [vmem:[#allocation2 + $0x50] ss:$8 sps:$4 sm:$0xff]  }
  0x2b   :  { %2915 = vmatprep.subr.bf16.mxu0 %v3459_v0  ;;  %v2957_v7 = vld [vmem:[#allocation2 + $0x64] ss:$8 sps:$4 sm:$0xff]   ;;  %378 = vmatpush1.bf16.msra.mxu1 %v2956_v5  ;;  %v2959_v8 = vld [vmem:[#allocation2 + $0x60] ss:$8 sps:$4 sm:$0xff]   ;;  %v2950_v10 = vld [vmem:[%s3709_s1 + $0x18] sm:$0xff]  }
  0x2c   :  { %379 = vmatprep.subr.bf16.mxu1 %v2957_v7  ;;  %v2951_v12 = vld [vmem:[%s3709_s1 + $0x10] sm:$0xff]   ;;  %v2963_v13 = vld [vmem:[#allocation2 + $0x44] ss:$8 sps:$4 sm:$0xff]   ;;  %v2965_v14 = vld [vmem:[#allocation2 + $0x40] ss:$8 sps:$4 sm:$0xff]   ;;  %409 = vmatprep.mubr.bf16.mxu1 %v3461_v26 }
  0x2d   :  { %v2966_v15 = vld [vmem:[#allocation2 + $0x34] ss:$8 sps:$4 sm:$0xff]   ;;  %v2952_v16 = vld [vmem:[%s3709_s1 + $0x8] sm:$0xff]   ;;  %v2968_v17 = vld [vmem:[#allocation2 + $0x30] ss:$8 sps:$4 sm:$0xff]  }
  0x2e   :  { %2916 = vmatpush3.bf16.msra.mxu0 %v2947_v2  ;;  %v2969_v18 = vld [vmem:[#allocation2 + $0x24] ss:$8 sps:$4 sm:$0xff]   ;;  %v2971_v20 = vld [vmem:[#allocation2 + $0x20] ss:$8 sps:$4 sm:$0xff]   ;;  %v2972_v21 = vld [vmem:[#allocation2 + $0x14] ss:$8 sps:$4 sm:$0xff]  }
  0x2f   :  { %2917 = vmatprep.subr.bf16.mxu0 %v3459_v0  ;;  %380 = vmatpush1.bf16.msra.mxu1 %v2959_v8  ;;  %v2953_v19 = vld [vmem:[%s3709_s1] sm:$0xff]   ;;  %v2974_v23 = vld [vmem:[#allocation2 + $0x10] ss:$8 sps:$4 sm:$0xff]   ;;  %v2983_v36 = vld [vmem:[#allocation4 + $0xec] ss:$16 sps:$4 sm:$0xff]  }
  0x30   :  { %381 = vmatprep.subr.bf16.mxu1 %v2960_v9  ;;  %v86_v22 = vld [vmem:[%s3708_s0] sm:$0xf]  ;;  %v2975_v24 = vld [vmem:[#allocation2 + $0x4] ss:$8 sps:$4 sm:$0xff]   ;;  %v2981_v38 = vld [vmem:[#allocation4 + $0xe8] ss:$16 sps:$4 sm:$0xff]  }
  0x31   :  { %v2977_v25 = vld [vmem:[#allocation2] ss:$8 sps:$4 sm:$0xff]   ;;  %v2980_v35 = vld [vmem:[#allocation4 + $0xe4] ss:$16 sps:$4 sm:$0xff]   ;;  %v2989_v40 = vld [vmem:[#allocation4 + $0xcc] ss:$16 sps:$4 sm:$0xff]  }
  0x32   :  { %2918 = vmatpush3.bf16.msra.mxu0 %v2948_v3  ;;  %v2617_v27 = vld [vmem:[%s3710_s2] ss:$0 sm:$0xff]  ;;  %v2986_v39 = vld [vmem:[#allocation4 + $0xc4] ss:$16 sps:$4 sm:$0xff]   ;;  %v2987_v42 = vld [vmem:[#allocation4 + $0xc8] ss:$16 sps:$4 sm:$0xff]  }
  0x33   :  { %2919 = vmatprep.subr.bf16.mxu0 %v3459_v0  ;;  %382 = vmatpush1.bf16.msra.mxu1 %v2962_v11  ;;  %v2978_v37 = vld [vmem:[#allocation4 + $0xe0] ss:$16 sps:$4 sm:$0xff]   ;;  %v2992_v43 = vld [vmem:[#allocation4 + $0xa4] ss:$16 sps:$4 sm:$0xff]   ;;  %v2995_v44 = vld [vmem:[#allocation4 + $0xac] ss:$16 sps:$4 sm:$0xff]  }
  0x34   :  { %383 = vmatprep.subr.bf16.mxu1 %v2963_v13  ;;  %v2984_v41 = vld [vmem:[#allocation4 + $0xc0] ss:$16 sps:$4 sm:$0xff]   ;;  %v2993_v46 = vld [vmem:[#allocation4 + $0xa8] ss:$16 sps:$4 sm:$0xff]   ;;  %v2998_v47 = vld [vmem:[#allocation4 + $0x84] ss:$16 sps:$4 sm:$0xff]  }
  0x35   :  { %v2990_v45 = vld [vmem:[#allocation4 + $0xa0] ss:$16 sps:$4 sm:$0xff]   ;;  %v3001_v48 = vld [vmem:[#allocation4 + $0x8c] ss:$16 sps:$4 sm:$0xff]   ;;  %v2999_v50 = vld [vmem:[#allocation4 + $0x88] ss:$16 sps:$4 sm:$0xff]  }
  0x36   :  { %2920 = vmatpush3.bf16.msra.mxu0 %v2949_v6  ;;  %v2996_v49 = vld [vmem:[#allocation4 + $0x80] ss:$16 sps:$4 sm:$0xff]   ;;  %v3004_v51 = vld [vmem:[#allocation4 + $0x64] ss:$16 sps:$4 sm:$0xff]   ;;  %v3007_v52 = vld [vmem:[#allocation4 + $0x6c] ss:$16 sps:$4 sm:$0xff]  }
  0x37   :  { %2921 = vmatprep.subr.bf16.mxu0 %v3459_v0  ;;  %384 = vmatpush1.bf16.msra.mxu1 %v2965_v14  ;;  %v3002_v53 = vld [vmem:[#allocation4 + $0x60] ss:$16 sps:$4 sm:$0xff]   ;;  %v3005_v54 = vld [vmem:[#allocation4 + $0x68] ss:$16 sps:$4 sm:$0xff]   ;;  %v3010_v55 = vld [vmem:[#allocation4 + $0x44] ss:$16 sps:$4 sm:$0xff]  }
  0x38   :  { %385 = vmatprep.subr.bf16.mxu1 %v2966_v15  ;;  %v3013_v56 = vld [vmem:[#allocation4 + $0x4c] ss:$16 sps:$4 sm:$0xff]   ;;  %v3008_v57 = vld [vmem:[#allocation4 + $0x40] ss:$16 sps:$4 sm:$0xff]   ;;  %v3011_v58 = vld [vmem:[#allocation4 + $0x48] ss:$16 sps:$4 sm:$0xff]  }
  0x39   :  { %v3016_v59 = vld [vmem:[#allocation4 + $0x24] ss:$16 sps:$4 sm:$0xff]   ;;  %v3019_v60 = vld [vmem:[#allocation4 + $0x2c] ss:$16 sps:$4 sm:$0xff]   ;;  %v3014_v61 = vld [vmem:[#allocation4 + $0x20] ss:$16 sps:$4 sm:$0xff]  }
  0x3a   :  { %2922 = vmatpush3.bf16.msra.mxu0 %v2950_v10  ;;  %v3017_v62 = vld [vmem:[#allocation4 + $0x28] ss:$16 sps:$4 sm:$0xff]   ;;  %v3022_v63 = vld [vmem:[#allocation4 + $0x4] ss:$16 sps:$4 sm:$0xff]   ;;  %v3020_v1 = vld [vmem:[#allocation4] ss:$16 sps:$4 sm:$0xff]  }
  0x3b   :  { %2923 = vmatprep.subr.bf16.mxu0 %v3459_v0  ;;  %386 = vmatpush1.bf16.msra.mxu1 %v2968_v17  ;;  %v3023_v2 = vld [vmem:[#allocation4 + $0x8] ss:$16 sps:$4 sm:$0xff]   ;;  %v3028_v3 = vld [vmem:[#allocation4 + $0x1e4] ss:$16 sps:$4 sm:$0xff]   ;;  %v3031_v4 = vld [vmem:[#allocation4 + $0x1ec] ss:$16 sps:$4 sm:$0xff]  }
  0x3c   :  { %387 = vmatprep.subr.bf16.mxu1 %v2969_v18  ;;  %v3026_v5 = vld [vmem:[#allocation4 + $0x1e0] ss:$16 sps:$4 sm:$0xff]   ;;  %v3029_v6 = vld [vmem:[#allocation4 + $0x1e8] ss:$16 sps:$4 sm:$0xff]   ;;  %v3034_v7 = vld [vmem:[#allocation4 + $0x1c4] ss:$16 sps:$4 sm:$0xff]  }
  0x3d   :  { %v3037_v8 = vld [vmem:[#allocation4 + $0x1cc] ss:$16 sps:$4 sm:$0xff]   ;;  %v3032_v9 = vld [vmem:[#allocation4 + $0x1c0] ss:$16 sps:$4 sm:$0xff]   ;;  %v3035_v10 = vld [vmem:[#allocation4 + $0x1c8] ss:$16 sps:$4 sm:$0xff]  }
  0x3e   :  { %2924 = vmatpush3.bf16.msra.mxu0 %v2951_v12  ;;  %v3040_v11 = vld [vmem:[#allocation4 + $0x1a4] ss:$16 sps:$4 sm:$0xff]   ;;  %v3043_v12 = vld [vmem:[#allocation4 + $0x1ac] ss:$16 sps:$4 sm:$0xff]   ;;  %v3038_v13 = vld [vmem:[#allocation4 + $0x1a0] ss:$16 sps:$4 sm:$0xff]  }
  0x3f   :  { %2925 = vmatprep.subr.bf16.mxu0 %v3459_v0  ;;  %388 = vmatpush1.bf16.msra.mxu1 %v2971_v20  ;;  %v3041_v14 = vld [vmem:[#allocation4 + $0x1a8] ss:$16 sps:$4 sm:$0xff]   ;;  %v3046_v15 = vld [vmem:[#allocation4 + $0x184] ss:$16 sps:$4 sm:$0xff]   ;;  %v3044_v17 = vld [vmem:[#allocation4 + $0x180] ss:$16 sps:$4 sm:$0xff]  }
  0x40   :  { %389 = vmatprep.subr.bf16.mxu1 %v2972_v21  ;;  %v3047_v18 = vld [vmem:[#allocation4 + $0x188] ss:$16 sps:$4 sm:$0xff]   ;;  %v3055_v20 = vld [vmem:[#allocation4 + $0x16c] ss:$16 sps:$4 sm:$0xff]   ;;  %v3050_v21 = vld [vmem:[#allocation4 + $0x160] ss:$16 sps:$4 sm:$0xff]  }
  0x41   :  { %v3059_v26 = vld [vmem:[#allocation4 + $0x148] ss:$16 sps:$4 sm:$0xff]  }
  0x42   :  { %2926 = vmatpush3.bf16.msra.mxu0 %v2952_v16  ;;  %v3049_v16 = vld [vmem:[#allocation4 + $0x18c] ss:$16 sps:$4 sm:$0xff]  }
  0x43   :  { %2927 = vmatprep.subr.bf16.mxu0 %v3459_v0  ;;  %390 = vmatpush1.bf16.msra.mxu1 %v2974_v23  ;;  %v3025_v0 = vld [vmem:[#allocation4 + $0xc] ss:$16 sps:$4 sm:$0xff]   ;;  %v3058_v23 = vld [vmem:[#allocation4 + $0x144] ss:$16 sps:$4 sm:$0xff]  }
  0x44   :  { %391 = vmatprep.subr.bf16.mxu1 %v2975_v24  ;;  %v3061_v24 = vld [vmem:[#allocation4 + $0x14c] ss:$16 sps:$4 sm:$0xff]  }
  0x46   :  { %2928 = vmatpush3.bf16.msra.mxu0 %v2953_v19  ;;  %v3052_v19 = vld [vmem:[#allocation4 + $0x164] ss:$16 sps:$4 sm:$0xff]  }
  0x47   :  { %392 = vmatpush1.bf16.msra.mxu1 %v2977_v25  ;;  %868 = vmatprep.subr.bf16.mxu0 %v2980_v35  ;;  %v3056_v25 = vld [vmem:[#allocation4 + $0x140] ss:$16 sps:$4 sm:$0xff]   ;;  %v287_v35 = vlaneseq }
  0x48   :  { %909 = vmatprep.subr.bf16.mxu1 %v2983_v36 }
  0x49   :  { %2930 = vmatmul.mubr.bf16.vlgmr.msra.gmra.mxu0 %v86_v22  ;;  %v3053_v22 = vld [vmem:[#allocation4 + $0x168] ss:$16 sps:$4 sm:$0xff]   ;;  %v3572_v36 = vshrl.u32 %v287_v35, 7 }
  0x4a   :  { %869 = vmatpush1.bf16.msra.mxu0 %v2978_v37 }
  0x4b   :  { %870 = vmatprep.subr.bf16.mxu0 %v2986_v39  ;;  %v3575_v37 = vsub.s32 0, %v3572_v36  ;;  %v3581_v39 = vsub.s32 1, %v3572_v36 }
  0x4e   :  { %871 = vmatpush1.bf16.msra.mxu0 %v2984_v41 }
  0x4f   :  { %872 = vmatprep.subr.bf16.mxu0 %v2992_v43 }
  0x52   :  { %873 = vmatpush1.bf16.msra.mxu0 %v2990_v45 }
  0x53   :  { %874 = vmatprep.subr.bf16.mxu0 %v2998_v47 }
  0x56   :  { %875 = vmatpush1.bf16.msra.mxu0 %v2996_v49 }
  0x57   :  { %876 = vmatprep.subr.bf16.mxu0 %v3004_v51 }
  0x5a   :  { %877 = vmatpush1.bf16.msra.mxu0 %v3002_v53 }
  0x5b   :  { %878 = vmatprep.subr.bf16.mxu0 %v3010_v55 }
  0x5e   :  { %879 = vmatpush1.bf16.msra.mxu0 %v3008_v57 }
  0x5f   :  { %880 = vmatprep.subr.bf16.mxu0 %v3016_v59 }
  0x62   :  { %881 = vmatpush1.bf16.msra.mxu0 %v3014_v61 }
  0x63   :  { %882 = vmatprep.subr.bf16.mxu0 %v3022_v63 }
  0x66   :  { %883 = vmatpush1.bf16.msra.mxu0 %v3020_v1 }
  0x67   :  { %884 = vmatprep.subr.bf16.mxu0 %v3028_v3 }
  0x6a   :  { %885 = vmatpush2.bf16.msra.mxu0 %v3026_v5 }
  0x6b   :  { %886 = vmatprep.subr.bf16.mxu0 %v3034_v7 }
  0x6e   :  { %887 = vmatpush2.bf16.msra.mxu0 %v3032_v9 }
  0x6f   :  { %888 = vmatprep.subr.bf16.mxu0 %v3040_v11 }
  0x72   :  { %889 = vmatpush2.bf16.msra.mxu0 %v3038_v13 }
  0x73   :  { %890 = vmatprep.subr.bf16.mxu0 %v3046_v15 }
  0x76   :  { %891 = vmatpush2.bf16.msra.mxu0 %v3044_v17 }
  0x77   :  { %892 = vmatprep.subr.bf16.mxu0 %v3052_v19 }
  0x7a   :  { %893 = vmatpush2.bf16.msra.mxu0 %v3050_v21 }
  0x7b   :  { %894 = vmatprep.subr.bf16.mxu0 %v3058_v23 }
  0x7e   :  { %895 = vmatpush2.bf16.msra.mxu0 %v3056_v25 }
 0x109   :  { %v278_v28 = vpop.f32.mrf.mxu0 }
 0x10a   :  { %v279_v29 = vadd.f32 %v2617_v27, %v278_v28  ;;  %v3064_v27 = vld [vmem:[#allocation4 + $0x124] ss:$16 sps:$4 sm:$0xff]   ;;  %v3067_v28 = vld [vmem:[#allocation4 + $0x12c] ss:$16 sps:$4 sm:$0xff]  }
 0x10b   :  { %v2931_v30 = vpop.f32.mrf.mxu0  ;;  %896 = vmatprep.subr.bf16.mxu0 %v3064_v27 }
 0x10c   :  { %v284_v31 = vmax.f32 %v279_v29, 0.0  ;;  %v3062_v29 = vld [vmem:[#allocation4 + $0x120] ss:$16 sps:$4 sm:$0xff]   ;;  %v3065_v30 = vld [vmem:[#allocation4 + $0x128] ss:$16 sps:$4 sm:$0xff]  }
 0x10d   :  { %v281_v32 = vpop.f32.mrf.mxu0  ;;  %897 = vmatpush2.bf16.msra.mxu0 %v3062_v29 }
 0x10e   :  { %v285_v33 = vpack.c.bf16 %v284_v31, %v284_v31  ;;  %v3070_v31 = vld [vmem:[#allocation4 + $0x104] ss:$16 sps:$4 sm:$0xff]   ;;  %v3073_v32 = vld [vmem:[#allocation4 + $0x10c] ss:$16 sps:$4 sm:$0xff]  }
 0x10f   :  { %v2932_v34 = vpop.f32.mrf.mxu0  ;;  %898 = vmatprep.subr.bf16.mxu0 %v3070_v31 }
 0x110   :  { %410 = vmatmul.mubr.bf16.vlgmr.msra.gmra.mxu1 %v285_v33  ;;  %v3068_v33 = vld [vmem:[#allocation4 + $0x100] ss:$16 sps:$4 sm:$0xff]   ;;  %v3071_v34 = vld [vmem:[#allocation4 + $0x108] ss:$16 sps:$4 sm:$0xff]  }
 0x111   :  { %910 = vmatpush1.bf16.msra.mxu1 %v2981_v38  ;;  %899 = vmatpush2.bf16.msra.mxu0 %v3068_v33  ;;  %v120_v38 = vld [vmem:[%s3712_s4] sm:$0x3] }
 0x112   :  { %911 = vmatprep.subr.bf16.mxu1 %v2989_v40  ;;  %v290_v40 = vrot.slane %v120_v38, %v3575_v37  ;;  %v294_v41 = vrot.slane %v120_v38, %v3581_v39 }
 0x115   :  { %912 = vmatpush1.bf16.msra.mxu1 %v2987_v42 }
 0x116   :  { %913 = vmatprep.subr.bf16.mxu1 %v2995_v44 }
 0x119   :  { %914 = vmatpush1.bf16.msra.mxu1 %v2993_v46 }
 0x11a   :  { %915 = vmatprep.subr.bf16.mxu1 %v3001_v48 }
 0x11d   :  { %916 = vmatpush1.bf16.msra.mxu1 %v2999_v50 }
 0x11e   :  { %917 = vmatprep.subr.bf16.mxu1 %v3007_v52 }
 0x121   :  { %918 = vmatpush1.bf16.msra.mxu1 %v3005_v54 }
 0x122   :  { %919 = vmatprep.subr.bf16.mxu1 %v3013_v56 }
 0x125   :  { %920 = vmatpush1.bf16.msra.mxu1 %v3011_v58 }
 0x126   :  { %921 = vmatprep.subr.bf16.mxu1 %v3019_v60 }
 0x129   :  { %922 = vmatpush1.bf16.msra.mxu1 %v3017_v62 }
 0x12a   :  { %923 = vmatprep.subr.bf16.mxu1 %v3025_v0 }
 0x12d   :  { %924 = vmatpush1.bf16.msra.mxu1 %v3023_v2 }
 0x12e   :  { %925 = vmatprep.subr.bf16.mxu1 %v3031_v4 }
 0x131   :  { %926 = vmatpush2.bf16.msra.mxu1 %v3029_v6 }
 0x132   :  { %927 = vmatprep.subr.bf16.mxu1 %v3037_v8 }
 0x135   :  { %928 = vmatpush2.bf16.msra.mxu1 %v3035_v10 }
 0x136   :  { %929 = vmatprep.subr.bf16.mxu1 %v3043_v12 }
 0x139   :  { %930 = vmatpush2.bf16.msra.mxu1 %v3041_v14 }
 0x13a   :  { %931 = vmatprep.subr.bf16.mxu1 %v3049_v16 }
 0x13d   :  { %932 = vmatpush2.bf16.msra.mxu1 %v3047_v18 }
 0x13e   :  { %933 = vmatprep.subr.bf16.mxu1 %v3055_v20  ;;  %v3462_v20 = vmov 1966171168  }
 0x13f   :  { %v461_v21 = vunpack.c.l.s4 %v3462_v20  ;;  %v3119_v20 = vld [vmem:[#allocation6 + $0x300] ss:$24 sps:$4 sm:$0xff]  }
 0x141   :  { %934 = vmatpush2.bf16.msra.mxu1 %v3053_v22  ;;  %v462_v22 = vunpack.c.0.s8 %v461_v21  ;;  %v3124_v21 = vld [vmem:[#allocation6 + $0x2d4] ss:$24 sps:$4 sm:$0xff]  }
 0x142   :  { %935 = vmatprep.subr.bf16.mxu1 %v3061_v24 }
 0x143   :  { %v3592_v24 = vsub.s32 %v462_v22, %v3572_v36  ;;  %v3127_v22 = vld [vmem:[#allocation6 + $0x5d4] ss:$24 sps:$4 sm:$0xff]  }
 0x145   :  { %936 = vmatpush2.bf16.msra.mxu1 %v3059_v26 }
 0x146   :  { %937 = vmatprep.subr.bf16.mxu1 %v3067_v28  ;;  %v121_v28 = vld [vmem:[%s3713_s5] sm:$0x3] }
 0x149   :  { %938 = vmatpush2.bf16.msra.mxu1 %v3065_v30 }
 0x14a   :  { %939 = vmatprep.subr.bf16.mxu1 %v3073_v32 }
 0x14d   :  { %940 = vmatpush2.bf16.msra.mxu1 %v3071_v34 }
 0x1d0   :  { %v411_v42 = vpop.f32.mrf.mxu1 }
 0x1d1   :  { %v3585_v43 = vadd.f32 %v411_v42, %v290_v40  ;;  %v122_v40 = vld [vmem:[%s3714_s6] sm:$0x3] }
 0x1d2   :  { %v413_v44 = vpop.f32.mrf.mxu1 }
 0x1d3   :  { %v418_v45 = vrot.slane %v3585_v43, 4  ;;  %v433_v46 = vmul.f32 %v3585_v43, %v3585_v43  ;;  %v414_v47 = vadd.f32 %v413_v44, %v294_v41 }
 0x1d4   :  { %v415_v48 = vpop.f32.mrf.mxu1 }
 0x1d5   :  { %v419_v49 = vadd.f32 %v418_v45, %v3585_v43  ;;  %v435_v50 = vrot.slane %v433_v46, 4  ;;  %v424_v51 = vrot.slane %v414_v47, 4  ;;  %v434_v52 = vmul.f32 %v414_v47, %v414_v47 }
 0x1d6   :  { %v416_v53 = vpop.f32.mrf.mxu1 }
 0x1d7   :  { %v420_v54 = vrot.slane %v419_v49, 2  ;;  %v436_v55 = vadd.f32 %v435_v50, %v433_v46  ;;  %v425_v56 = vadd.f32 %v424_v51, %v414_v47  ;;  %v441_v57 = vrot.slane %v434_v52, 4 }
 0x1d9   :  { %v421_v58 = vadd.f32 %v420_v54, %v419_v49  ;;  %v437_v59 = vrot.slane %v436_v55, 2  ;;  %v426_v60 = vrot.slane %v425_v56, 2  ;;  %v442_v61 = vadd.f32 %v441_v57, %v434_v52  ;;  %v3074_v57 = vld [vmem:[#allocation6 + $0x150] ss:$24 sps:$4 sm:$0xff]  }
 0x1db   :  { %v422_v62 = vrot.slane %v421_v58, 1  ;;  %v438_v63 = vadd.f32 %v437_v59, %v436_v55  ;;  %v427_v0 = vadd.f32 %v426_v60, %v425_v56  ;;  %v443_v1 = vrot.slane %v442_v61, 2  ;;  %v3076_v55 = vld [vmem:[#allocation6 + $0x154] ss:$24 sps:$4 sm:$0xff]   ;;  %v3080_v59 = vld [vmem:[#allocation6 + $0x120] ss:$24 sps:$4 sm:$0xff]  }
 0x1dc   :  { %v3079_v56 = vld [vmem:[#allocation6 + $0x454] ss:$24 sps:$4 sm:$0xff]   ;;  %2332 = vmatprep.subr.bf16.mxu0 %v3076_v55  ;;  %v3083_v60 = vld [vmem:[#allocation6 + $0x420] ss:$24 sps:$4 sm:$0xff]   ;;  %v3166_v55 = vld [vmem:[#allocation6 + $0x184] ss:$24 sps:$4 sm:$0xff]  }
 0x1dd   :  { %v423_v2 = vadd.f32 %v422_v62, %v421_v58  ;;  %v439_v3 = vrot.slane %v438_v63, 1  ;;  %v428_v4 = vrot.slane %v427_v0, 1  ;;  %v444_v5 = vadd.f32 %v443_v1, %v442_v61  ;;  %2373 = vmatprep.subr.bf16.mxu1 %v3079_v56  ;;  %v3085_v58 = vld [vmem:[#allocation6 + $0x424] ss:$24 sps:$4 sm:$0xff]   ;;  %v3088_v61 = vld [vmem:[#allocation6 + $0xf4] ss:$24 sps:$4 sm:$0xff]  }
 0x1de   :  { %v3091_v62 = vld [vmem:[#allocation6 + $0x3f4] ss:$24 sps:$4 sm:$0xff]   ;;  %v3094_v1 = vld [vmem:[#allocation6 + $0xc4] ss:$24 sps:$4 sm:$0xff]  }
 0x1df   :  { %v431_v6 = vmul.f32 0.125, %v423_v2  ;;  %v440_v7 = vadd.f32 %v439_v3, %v438_v63  ;;  %v429_v8 = vadd.f32 %v428_v4, %v427_v0  ;;  %v445_v9 = vrot.slane %v444_v5, 1  ;;  %v3086_v63 = vld [vmem:[#allocation6 + $0xf0] ss:$24 sps:$4 sm:$0xff]   ;;  %v3097_v2 = vld [vmem:[#allocation6 + $0x3c4] ss:$24 sps:$4 sm:$0xff]  }
 0x1e0   :  { %v3089_v0 = vld [vmem:[#allocation6 + $0x3f0] ss:$24 sps:$4 sm:$0xff]   ;;  %v3092_v3 = vld [vmem:[#allocation6 + $0xc0] ss:$24 sps:$4 sm:$0xff]   ;;  %v3169_v56 = vld [vmem:[#allocation6 + $0x484] ss:$24 sps:$4 sm:$0xff]  }
 0x1e1   :  { %v447_v10 = vmul.f32 0.125, %v440_v7  ;;  %v449_v11 = vmul.f32 %v431_v6, %v431_v6  ;;  %v446_v12 = vadd.f32 %v445_v9, %v444_v5  ;;  %v432_v13 = vmul.f32 0.125, %v429_v8  ;;  %v3095_v4 = vld [vmem:[#allocation6 + $0x3c0] ss:$24 sps:$4 sm:$0xff]   ;;  %v3100_v5 = vld [vmem:[#allocation6 + $0x94] ss:$24 sps:$4 sm:$0xff]  }
 0x1e2   :  { %v3098_v7 = vld [vmem:[#allocation6 + $0x90] ss:$24 sps:$4 sm:$0xff]   ;;  %v3104_v9 = vld [vmem:[#allocation6 + $0x60] ss:$24 sps:$4 sm:$0xff]  }
 0x1e3   :  { %v451_v14 = vsub.f32 %v447_v10, %v449_v11  ;;  %v448_v15 = vmul.f32 0.125, %v446_v12  ;;  %v450_v16 = vmul.f32 %v432_v13, %v432_v13  ;;  %v3101_v8 = vld [vmem:[#allocation6 + $0x390] ss:$24 sps:$4 sm:$0xff]   ;;  %v3106_v10 = vld [vmem:[#allocation6 + $0x64] ss:$24 sps:$4 sm:$0xff]  }
 0x1e4   :  { %v3107_v11 = vld [vmem:[#allocation6 + $0x360] ss:$24 sps:$4 sm:$0xff]   ;;  %v3109_v12 = vld [vmem:[#allocation6 + $0x364] ss:$24 sps:$4 sm:$0xff]  }
 0x1e5   :  { %v453_v17 = vadd.f32 0.8, %v451_v14  ;;  %v452_v18 = vsub.f32 %v448_v15, %v450_v16  ;;  %v3115_v14 = vld [vmem:[#allocation6 + $0x334] ss:$24 sps:$4 sm:$0xff]   ;;  %v3110_v15 = vld [vmem:[#allocation6 + $0x30] ss:$24 sps:$4 sm:$0xff]  }
 0x1e6   :  { %v3113_v16 = vld [vmem:[#allocation6 + $0x330] ss:$24 sps:$4 sm:$0xff]  }
 0x1e7   :  { %v454_v19 = vadd.f32 0.8, %v452_v18  ;;  %3362 = vrsqrt.f32 %v453_v17  ;;  %v3118_v17 = vld [vmem:[#allocation6 + $0x4] ss:$24 sps:$4 sm:$0xff]  }
 0x1e8   :  { %v3121_v18 = vld [vmem:[#allocation6 + $0x304] ss:$24 sps:$4 sm:$0xff]  }
 0x1e9   :  { %3364 = vrsqrt.f32 %v454_v19  ;;  %v3116_v19 = vld [vmem:[#allocation6] ss:$24 sps:$4 sm:$0xff]  }
 0x1f4   :  { %v3363_v23 = vpop.eup %3362 }
 0x1f6   :  { %v3365_v25 = vpop.eup %3364 }
 0x1f7   :  { %v459_v26 = vcombine.low %v3363_v23, %v3365_v25  ;;  %v3122_v23 = vld [vmem:[#allocation6 + $0x2d0] ss:$24 sps:$4 sm:$0xff]  }
 0x1f8   :  { %v3125_v25 = vld [vmem:[#allocation6 + $0x5d0] ss:$24 sps:$4 sm:$0xff]  }
 0x1f9   :  { %v466_v27 = vrot.slane %v459_v26, %v3592_v24  ;;  %v3130_v26 = vld [vmem:[#allocation6 + $0x2a4] ss:$24 sps:$4 sm:$0xff]  }
 0x1fb   :  { %v473_v29 = vrot.slane %v466_v27, %v3592_v24  ;;  %v3133_v27 = vld [vmem:[#allocation6 + $0x5a4] ss:$24 sps:$4 sm:$0xff]  }
 0x1fd   :  { %v475_v30 = vmul.f32 %v473_v29, %v121_v28  ;;  %v3128_v28 = vld [vmem:[#allocation6 + $0x2a0] ss:$24 sps:$4 sm:$0xff]  }
 0x1fe   :  { %v3131_v29 = vld [vmem:[#allocation6 + $0x5a0] ss:$24 sps:$4 sm:$0xff]  }
 0x1ff   :  { %v480_v31 = vrot.slane %v475_v30, %v3575_v37  ;;  %v484_v32 = vrot.slane %v475_v30, %v3581_v39  ;;  %v3136_v30 = vld [vmem:[#allocation6 + $0x274] ss:$24 sps:$4 sm:$0xff]  }
 0x201   :  { %v489_v33 = vmul.f32 %v480_v31, %v431_v6  ;;  %v490_v34 = vmul.f32 %v484_v32, %v432_v13  ;;  %v488_v44 = vmul.f32 %v484_v32, %v414_v47  ;;  %v487_v46 = vmul.f32 %v480_v31, %v3585_v43  ;;  %v3077_v47 = vld [vmem:[#allocation6 + $0x450] ss:$24 sps:$4 sm:$0xff]   ;;  %v3082_v43 = vld [vmem:[#allocation6 + $0x124] ss:$24 sps:$4 sm:$0xff]   ;;  %v3103_v6 = vld [vmem:[#allocation6 + $0x394] ss:$24 sps:$4 sm:$0xff]  }
 0x202   :  { %v3112_v13 = vld [vmem:[#allocation6 + $0x34] ss:$24 sps:$4 sm:$0xff]   ;;  %v3134_v32 = vld [vmem:[#allocation6 + $0x270] ss:$24 sps:$4 sm:$0xff]  }
 0x203   :  { %v493_v35 = vcombine.low %v489_v33, %v490_v34  ;;  %v3139_v31 = vld [vmem:[#allocation6 + $0x574] ss:$24 sps:$4 sm:$0xff]   ;;  %v3137_v33 = vld [vmem:[#allocation6 + $0x570] ss:$24 sps:$4 sm:$0xff]   ;;  %v3142_v34 = vld [vmem:[#allocation6 + $0x244] ss:$24 sps:$4 sm:$0xff]  }
 0x205   :  { %v500_v38 = vrot.slane %v493_v35, %v3592_v24  ;;  %v3145_v35 = vld [vmem:[#allocation6 + $0x544] ss:$24 sps:$4 sm:$0xff]  }
 0x207   :  { %v507_v41 = vrot.slane %v500_v38, %v3592_v24  ;;  %v3140_v38 = vld [vmem:[#allocation6 + $0x240] ss:$24 sps:$4 sm:$0xff]  }
 0x209   :  { %v509_v42 = vsub.f32 %v122_v40, %v507_v41  ;;  %v3143_v40 = vld [vmem:[#allocation6 + $0x540] ss:$24 sps:$4 sm:$0xff]   ;;  %v3148_v41 = vld [vmem:[#allocation6 + $0x214] ss:$24 sps:$4 sm:$0xff]  }
 0x20b   :  { %v518_v45 = vrot.slane %v509_v42, %v3581_v39  ;;  %v514_v48 = vrot.slane %v509_v42, %v3575_v37  ;;  %v3151_v42 = vld [vmem:[#allocation6 + $0x514] ss:$24 sps:$4 sm:$0xff]  }
 0x20d   :  { %v522_v49 = vadd.f32 %v518_v45, %v488_v44  ;;  %v521_v50 = vadd.f32 %v514_v48, %v487_v46  ;;  %v3146_v44 = vld [vmem:[#allocation6 + $0x210] ss:$24 sps:$4 sm:$0xff]   ;;  %v3154_v46 = vld [vmem:[#allocation6 + $0x1e4] ss:$24 sps:$4 sm:$0xff]  }
 0x20e   :  { %v3149_v45 = vld [vmem:[#allocation6 + $0x510] ss:$24 sps:$4 sm:$0xff]   ;;  %v3157_v48 = vld [vmem:[#allocation6 + $0x4e4] ss:$24 sps:$4 sm:$0xff]  }
 0x20f   :  { %v524_v51 = vmax.f32 %v522_v49, 0.0  ;;  %v523_v52 = vmax.f32 %v521_v50, 0.0  ;;  %v3152_v49 = vld [vmem:[#allocation6 + $0x1e0] ss:$24 sps:$4 sm:$0xff]  }
 0x210   :  { %v3155_v50 = vld [vmem:[#allocation6 + $0x4e0] ss:$24 sps:$4 sm:$0xff]  }
 0x211   :  { %v526_v53 = vpack.c.bf16 %v524_v51, %v524_v51  ;;  %v525_v54 = vpack.c.bf16 %v523_v52, %v523_v52  ;;  %v3160_v51 = vld [vmem:[#allocation6 + $0x1b4] ss:$24 sps:$4 sm:$0xff]  }
 0x212   :  { %v3163_v52 = vld [vmem:[#allocation6 + $0x4b4] ss:$24 sps:$4 sm:$0xff]  }
 0x213   :  { %900 = vmatprep.mubr.bf16.mxu0 %v526_v53  ;;  %941 = vmatprep.mubr.bf16.mxu1 %v526_v53  ;;  %v3158_v53 = vld [vmem:[#allocation6 + $0x1b0] ss:$24 sps:$4 sm:$0xff]  }
 0x214   :  { %901 = vmatmul.mubr.bf16.vlgmr.msra.gmra.mxu0 %v525_v54  ;;  %942 = vmatmul.mubr.bf16.vlgmr.msra.gmra.mxu1 %v525_v54  ;;  %v3161_v54 = vld [vmem:[#allocation6 + $0x4b0] ss:$24 sps:$4 sm:$0xff]  }
 0x215   :  { %2333 = vmatpush1.bf16.msra.mxu0 %v3074_v57  ;;  %2374 = vmatpush1.bf16.msra.mxu1 %v3077_v47  ;;  %v3164_v57 = vld [vmem:[#allocation6 + $0x180] ss:$24 sps:$4 sm:$0xff]  }
 0x216   :  { %2334 = vmatprep.subr.bf16.mxu0 %v3082_v43  ;;  %2375 = vmatprep.subr.bf16.mxu1 %v3085_v58  ;;  %v3167_v47 = vld [vmem:[#allocation6 + $0x480] ss:$24 sps:$4 sm:$0xff]   ;;  %v3172_v43 = vld [vmem:[#allocation6 + $0x15c] ss:$24 sps:$4 sm:$0xff]  }
 0x217   :  { %v3175_v58 = vld [vmem:[#allocation6 + $0x45c] ss:$24 sps:$4 sm:$0xff]  }
 0x219   :  { %2335 = vmatpush1.bf16.msra.mxu0 %v3080_v59  ;;  %2376 = vmatpush1.bf16.msra.mxu1 %v3083_v60  ;;  %v3610_v59 = vsub.s32 2, %v3572_v36  ;;  %v187_v60 = vld [vmem:[%s3716_s8] sm:$0xf] }
 0x21a   :  { %2336 = vmatprep.subr.bf16.mxu0 %v3088_v61  ;;  %2377 = vmatprep.subr.bf16.mxu1 %v3091_v62  ;;  %v3616_v61 = vsub.s32 3, %v3572_v36  ;;  %v531_v62 = vrot.slane %v187_v60, %v3575_v37 }
 0x21d   :  { %2337 = vmatpush1.bf16.msra.mxu0 %v3086_v63  ;;  %2378 = vmatpush1.bf16.msra.mxu1 %v3089_v0  ;;  %v539_v63 = vrot.slane %v187_v60, %v3610_v59 }
 0x21e   :  { %2338 = vmatprep.subr.bf16.mxu0 %v3094_v1  ;;  %2379 = vmatprep.subr.bf16.mxu1 %v3097_v2  ;;  %v535_v2 = vrot.slane %v187_v60, %v3581_v39 }
 0x221   :  { %2339 = vmatpush1.bf16.msra.mxu0 %v3092_v3  ;;  %2380 = vmatpush1.bf16.msra.mxu1 %v3095_v4  ;;  %v543_v3 = vrot.slane %v187_v60, %v3616_v61 }
 0x222   :  { %2340 = vmatprep.subr.bf16.mxu0 %v3100_v5  ;;  %2381 = vmatprep.subr.bf16.mxu1 %v3103_v6 }
 0x225   :  { %2341 = vmatpush1.bf16.msra.mxu0 %v3098_v7  ;;  %2382 = vmatpush1.bf16.msra.mxu1 %v3101_v8 }
 0x226   :  { %2342 = vmatprep.subr.bf16.mxu0 %v3106_v10  ;;  %2383 = vmatprep.subr.bf16.mxu1 %v3109_v12 }
 0x229   :  { %2343 = vmatpush1.bf16.msra.mxu0 %v3104_v9  ;;  %2384 = vmatpush1.bf16.msra.mxu1 %v3107_v11 }
 0x22a   :  { %2344 = vmatprep.subr.bf16.mxu0 %v3112_v13  ;;  %2385 = vmatprep.subr.bf16.mxu1 %v3115_v14 }
 0x22d   :  { %2345 = vmatpush1.bf16.msra.mxu0 %v3110_v15  ;;  %2386 = vmatpush1.bf16.msra.mxu1 %v3113_v16 }
 0x22e   :  { %2346 = vmatprep.subr.bf16.mxu0 %v3118_v17  ;;  %2387 = vmatprep.subr.bf16.mxu1 %v3121_v18 }
 0x231   :  { %2347 = vmatpush1.bf16.msra.mxu0 %v3116_v19  ;;  %2388 = vmatpush1.bf16.msra.mxu1 %v3119_v20 }
 0x232   :  { %2348 = vmatprep.subr.bf16.mxu0 %v3124_v21  ;;  %2389 = vmatprep.subr.bf16.mxu1 %v3127_v22 }
 0x235   :  { %2349 = vmatpush2.bf16.msra.mxu0 %v3122_v23  ;;  %2390 = vmatpush2.bf16.msra.mxu1 %v3125_v25 }
 0x236   :  { %2350 = vmatprep.subr.bf16.mxu0 %v3130_v26  ;;  %2391 = vmatprep.subr.bf16.mxu1 %v3133_v27 }
 0x239   :  { %2351 = vmatpush2.bf16.msra.mxu0 %v3128_v28  ;;  %2392 = vmatpush2.bf16.msra.mxu1 %v3131_v29 }
 0x23a   :  { %2352 = vmatprep.subr.bf16.mxu0 %v3136_v30  ;;  %2393 = vmatprep.subr.bf16.mxu1 %v3139_v31 }
 0x23d   :  { %2353 = vmatpush2.bf16.msra.mxu0 %v3134_v32  ;;  %2394 = vmatpush2.bf16.msra.mxu1 %v3137_v33 }
 0x23e   :  { %2354 = vmatprep.subr.bf16.mxu0 %v3142_v34  ;;  %2395 = vmatprep.subr.bf16.mxu1 %v3145_v35 }
 0x241   :  { %2355 = vmatpush2.bf16.msra.mxu0 %v3140_v38  ;;  %2396 = vmatpush2.bf16.msra.mxu1 %v3143_v40 }
 0x242   :  { %2356 = vmatprep.subr.bf16.mxu0 %v3148_v41  ;;  %2397 = vmatprep.subr.bf16.mxu1 %v3151_v42 }
 0x245   :  { %2357 = vmatpush2.bf16.msra.mxu0 %v3146_v44  ;;  %2398 = vmatpush2.bf16.msra.mxu1 %v3149_v45 }
 0x246   :  { %2358 = vmatprep.subr.bf16.mxu0 %v3154_v46  ;;  %2399 = vmatprep.subr.bf16.mxu1 %v3157_v48 }
 0x249   :  { %2359 = vmatpush2.bf16.msra.mxu0 %v3152_v49  ;;  %2400 = vmatpush2.bf16.msra.mxu1 %v3155_v50 }
 0x24a   :  { %2360 = vmatprep.subr.bf16.mxu0 %v3160_v51  ;;  %2401 = vmatprep.subr.bf16.mxu1 %v3163_v52 }
 0x24d   :  { %2361 = vmatpush2.bf16.msra.mxu0 %v3158_v53  ;;  %2402 = vmatpush2.bf16.msra.mxu1 %v3161_v54 }
 0x24e   :  { %2362 = vmatprep.subr.bf16.mxu0 %v3166_v55  ;;  %2403 = vmatprep.subr.bf16.mxu1 %v3169_v56 }
 0x251   :  { %2363 = vmatpush2.bf16.msra.mxu0 %v3164_v57  ;;  %2404 = vmatpush2.bf16.msra.mxu1 %v3167_v47 }
 0x252   :  { %2414 = vmatprep.subr.bf16.mxu0 %v3172_v43  ;;  %2455 = vmatprep.subr.bf16.mxu1 %v3175_v58 }
 0x2d4   :  { %v902_v0 = vpop.f32.mrf.mxu0  ;;  %v943_v1 = vpop.f32.mrf.mxu1 }
 0x2d5   :  { %v3622_v4 = vadd.f32 %v902_v0, %v531_v62  ;;  %v3624_v5 = vadd.f32 %v943_v1, %v539_v63 }
 0x2d6   :  { %v904_v6 = vpop.f32.mrf.mxu0  ;;  %v945_v7 = vpop.f32.mrf.mxu1 }
 0x2d7   :  { %v950_v8 = vrot.slane %v3622_v4, 4  ;;  %v978_v9 = vmul.f32 %v3622_v4, %v3622_v4  ;;  %v962_v10 = vrot.slane %v3624_v5, 4  ;;  %v980_v11 = vmul.f32 %v3624_v5, %v3624_v5 }
 0x2d8   :  { %v3632_v12 = vadd.f32 %v904_v6, %v535_v2  ;;  %v3634_v13 = vadd.f32 %v945_v7, %v543_v3  ;;  %v906_v14 = vpop.f32.mrf.mxu0  ;;  %v947_v15 = vpop.f32.mrf.mxu1 }
 0x2d9   :  { %v951_v16 = vadd.f32 %v950_v8, %v3622_v4  ;;  %v982_v17 = vrot.slane %v978_v9, 4  ;;  %v963_v18 = vadd.f32 %v962_v10, %v3624_v5  ;;  %v994_v19 = vrot.slane %v980_v11, 4 }
 0x2da   :  { %v956_v20 = vrot.slane %v3632_v12, 4  ;;  %v979_v21 = vmul.f32 %v3632_v12, %v3632_v12  ;;  %v968_v22 = vrot.slane %v3634_v13, 4  ;;  %v981_v23 = vmul.f32 %v3634_v13, %v3634_v13  ;;  %v907_v25 = vpop.f32.mrf.mxu0  ;;  %v948_v26 = vpop.f32.mrf.mxu1 }
 0x2db   :  { %v952_v27 = vrot.slane %v951_v16, 2  ;;  %v983_v28 = vadd.f32 %v982_v17, %v978_v9  ;;  %v964_v29 = vrot.slane %v963_v18, 2  ;;  %v995_v30 = vadd.f32 %v994_v19, %v980_v11 }
 0x2dc   :  { %v957_v31 = vadd.f32 %v956_v20, %v3632_v12  ;;  %v988_v32 = vrot.slane %v979_v21, 4  ;;  %v969_v33 = vadd.f32 %v968_v22, %v3634_v13  ;;  %v1000_v34 = vrot.slane %v981_v23, 4 }
 0x2dd   :  { %v953_v35 = vadd.f32 %v952_v27, %v951_v16  ;;  %v984_v38 = vrot.slane %v983_v28, 2  ;;  %v965_v40 = vadd.f32 %v964_v29, %v963_v18  ;;  %v996_v41 = vrot.slane %v995_v30, 2 }
 0x2de   :  { %v958_v42 = vrot.slane %v957_v31, 2  ;;  %v989_v44 = vadd.f32 %v988_v32, %v979_v21  ;;  %v970_v45 = vrot.slane %v969_v33, 2  ;;  %v1001_v46 = vadd.f32 %v1000_v34, %v981_v23 }
 0x2df   :  { %v954_v48 = vrot.slane %v953_v35, 1  ;;  %v985_v49 = vadd.f32 %v984_v38, %v983_v28  ;;  %v966_v50 = vrot.slane %v965_v40, 1  ;;  %v997_v51 = vadd.f32 %v996_v41, %v995_v30 }
 0x2e0   :  { %v959_v52 = vadd.f32 %v958_v42, %v957_v31  ;;  %v990_v53 = vrot.slane %v989_v44, 2  ;;  %v971_v54 = vadd.f32 %v970_v45, %v969_v33  ;;  %v1002_v55 = vrot.slane %v1001_v46, 2 }
 0x2e1   :  { %v955_v56 = vadd.f32 %v954_v48, %v953_v35  ;;  %v986_v57 = vrot.slane %v985_v49, 1  ;;  %v967_v47 = vadd.f32 %v966_v50, %v965_v40  ;;  %v998_v43 = vrot.slane %v997_v51, 1 }
 0x2e2   :  { %v960_v58 = vrot.slane %v959_v52, 1  ;;  %v991_v60 = vadd.f32 %v990_v53, %v989_v44  ;;  %v972_v62 = vrot.slane %v971_v54, 1  ;;  %v1003_v63 = vadd.f32 %v1002_v55, %v1001_v46  ;;  %v188_v46 = vld [vmem:[%s3717_s9] sm:$0xf] }
 0x2e3   :  { %v974_v0 = vmul.f32 0.125, %v955_v56  ;;  %v987_v1 = vadd.f32 %v986_v57, %v985_v49  ;;  %v976_v2 = vmul.f32 0.125, %v967_v47  ;;  %v999_v3 = vadd.f32 %v998_v43, %v997_v51 }
 0x2e4   :  { %v961_v6 = vadd.f32 %v960_v58, %v959_v52  ;;  %v992_v7 = vrot.slane %v991_v60, 1  ;;  %v973_v8 = vadd.f32 %v972_v62, %v971_v54  ;;  %v1004_v9 = vrot.slane %v1003_v63, 1 }
 0x2e5   :  { %v1006_v10 = vmul.f32 0.125, %v987_v1  ;;  %v1010_v11 = vmul.f32 %v974_v0, %v974_v0  ;;  %v1008_v14 = vmul.f32 0.125, %v999_v3  ;;  %v1012_v15 = vmul.f32 %v976_v2, %v976_v2 }
 0x2e6   :  { %v993_v16 = vadd.f32 %v992_v7, %v991_v60  ;;  %v977_v17 = vmul.f32 0.125, %v973_v8  ;;  %v1005_v18 = vadd.f32 %v1004_v9, %v1003_v63  ;;  %v975_v19 = vmul.f32 0.125, %v961_v6  ;;  %v189_v63 = vld [vmem:[%s3718_s10] sm:$0xf] }
 0x2e7   :  { %v1014_v20 = vsub.f32 %v1006_v10, %v1010_v11  ;;  %v1016_v21 = vsub.f32 %v1008_v14, %v1012_v15 }
 0x2e8   :  { %v1007_v22 = vmul.f32 0.125, %v993_v16  ;;  %v1009_v23 = vmul.f32 0.125, %v1005_v18  ;;  %v1013_v25 = vmul.f32 %v977_v17, %v977_v17  ;;  %v1011_v26 = vmul.f32 %v975_v19, %v975_v19 }
 0x2e9   :  { %v1018_v27 = vadd.f32 0.8, %v1014_v20  ;;  %v1020_v28 = vadd.f32 0.8, %v1016_v21  ;;  %v3173_v20 = vld [vmem:[#allocation6 + $0x458] ss:$24 sps:$4 sm:$0xff]  }
 0x2ea   :  { %v1017_v29 = vsub.f32 %v1009_v23, %v1013_v25  ;;  %v1015_v30 = vsub.f32 %v1007_v22, %v1011_v26  ;;  %v3178_v23 = vld [vmem:[#allocation6 + $0x12c] ss:$24 sps:$4 sm:$0xff]   ;;  %v3176_v26 = vld [vmem:[#allocation6 + $0x128] ss:$24 sps:$4 sm:$0xff]  }
 0x2eb   :  { %3366 = vrsqrt.f32 %v1018_v27  ;;  %v3181_v25 = vld [vmem:[#allocation6 + $0x42c] ss:$24 sps:$4 sm:$0xff]   ;;  %v3179_v27 = vld [vmem:[#allocation6 + $0x428] ss:$24 sps:$4 sm:$0xff]  }
 0x2ec   :  { %v1021_v31 = vadd.f32 0.8, %v1017_v29  ;;  %v1019_v32 = vadd.f32 0.8, %v1015_v30  ;;  %3368 = vrsqrt.f32 %v1020_v28  ;;  %v3184_v28 = vld [vmem:[#allocation6 + $0xfc] ss:$24 sps:$4 sm:$0xff]  }
 0x2ed   :  { %v3187_v29 = vld [vmem:[#allocation6 + $0x3fc] ss:$24 sps:$4 sm:$0xff]   ;;  %v3182_v30 = vld [vmem:[#allocation6 + $0xf8] ss:$24 sps:$4 sm:$0xff]  }
 0x2ee   :  { %3370 = vrsqrt.f32 %v1021_v31  ;;  %v3185_v31 = vld [vmem:[#allocation6 + $0x3f8] ss:$24 sps:$4 sm:$0xff]  }
 0x2ef   :  { %3372 = vrsqrt.f32 %v1019_v32  ;;  %v3190_v32 = vld [vmem:[#allocation6 + $0xcc] ss:$24 sps:$4 sm:$0xff]  }
 0x2f8   :  { %v3367_v33 = vpop.eup %3366 }
 0x2f9   :  { %v3369_v34 = vpop.eup %3368 }
 0x2fb   :  { %v3371_v35 = vpop.eup %3370 }
 0x2fc   :  { %v3373_v38 = vpop.eup %3372  ;;  %v1031_v40 = vcombine.low %v3369_v34, %v3371_v35  ;;  %v3188_v34 = vld [vmem:[#allocation6 + $0xc8] ss:$24 sps:$4 sm:$0xff]  }
 0x2fd   :  { %v1030_v41 = vcombine.low %v3367_v33, %v3373_v38  ;;  %v3193_v33 = vld [vmem:[#allocation6 + $0x3cc] ss:$24 sps:$4 sm:$0xff]   ;;  %v3191_v35 = vld [vmem:[#allocation6 + $0x3c8] ss:$24 sps:$4 sm:$0xff]   ;;  %v3196_v38 = vld [vmem:[#allocation6 + $0x9c] ss:$24 sps:$4 sm:$0xff]  }
 0x2fe   :  { %v1045_v42 = vrot.slane %v1031_v40, %v3592_v24  ;;  %v3199_v40 = vld [vmem:[#allocation6 + $0x39c] ss:$24 sps:$4 sm:$0xff]  }
 0x2ff   :  { %v1038_v44 = vrot.slane %v1030_v41, %v3592_v24  ;;  %v3194_v41 = vld [vmem:[#allocation6 + $0x98] ss:$24 sps:$4 sm:$0xff]  }
 0x301   :  { %v1046_v45 = vcombine.low %v1038_v44, %v1045_v42  ;;  %v3197_v42 = vld [vmem:[#allocation6 + $0x398] ss:$24 sps:$4 sm:$0xff]   ;;  %v3202_v44 = vld [vmem:[#allocation6 + $0x6c] ss:$24 sps:$4 sm:$0xff]  }
 0x303   :  { %v1053_v48 = vrot.slane %v1046_v45, %v3592_v24  ;;  %v3205_v45 = vld [vmem:[#allocation6 + $0x36c] ss:$24 sps:$4 sm:$0xff]  }
 0x305   :  { %v1055_v49 = vmul.f32 %v1053_v48, %v188_v46  ;;  %v3200_v46 = vld [vmem:[#allocation6 + $0x68] ss:$24 sps:$4 sm:$0xff]  }
 0x306   :  { %v3203_v48 = vld [vmem:[#allocation6 + $0x368] ss:$24 sps:$4 sm:$0xff]  }
 0x307   :  { %v1060_v50 = vrot.slane %v1055_v49, %v3575_v37  ;;  %v1064_v51 = vrot.slane %v1055_v49, %v3581_v39  ;;  %v1068_v52 = vrot.slane %v1055_v49, %v3610_v59  ;;  %v1072_v53 = vrot.slane %v1055_v49, %v3616_v61  ;;  %v3208_v49 = vld [vmem:[#allocation6 + $0x3c] ss:$24 sps:$4 sm:$0xff]  }
 0x309   :  { %v1081_v54 = vmul.f32 %v1060_v50, %v974_v0  ;;  %v1082_v55 = vmul.f32 %v1064_v51, %v975_v19  ;;  %v1083_v56 = vmul.f32 %v1068_v52, %v976_v2  ;;  %v1084_v57 = vmul.f32 %v1072_v53, %v977_v17 }
 0x30a   :  { %v1078_v6 = vmul.f32 %v1064_v51, %v3632_v12  ;;  %v1080_v0 = vmul.f32 %v1072_v53, %v3634_v13  ;;  %v1077_v2 = vmul.f32 %v1060_v50, %v3622_v4  ;;  %v1079_v7 = vmul.f32 %v1068_v52, %v3624_v5  ;;  %v3170_v5 = vld [vmem:[#allocation6 + $0x158] ss:$24 sps:$4 sm:$0xff]   ;;  %v3211_v50 = vld [vmem:[#allocation6 + $0x33c] ss:$24 sps:$4 sm:$0xff]   ;;  %v3214_v53 = vld [vmem:[#allocation6 + $0xc] ss:$24 sps:$4 sm:$0xff]  }
 0x30b   :  { %v1089_v47 = vcombine.low %v1081_v54, %v1082_v55  ;;  %v1090_v43 = vcombine.low %v1083_v56, %v1084_v57  ;;  %v3206_v51 = vld [vmem:[#allocation6 + $0x38] ss:$24 sps:$4 sm:$0xff]   ;;  %v3217_v54 = vld [vmem:[#allocation6 + $0x30c] ss:$24 sps:$4 sm:$0xff]   ;;  %v3212_v55 = vld [vmem:[#allocation6 + $0x8] ss:$24 sps:$4 sm:$0xff]  }
 0x30c   :  { %v3209_v52 = vld [vmem:[#allocation6 + $0x338] ss:$24 sps:$4 sm:$0xff]   ;;  %v3215_v56 = vld [vmem:[#allocation6 + $0x308] ss:$24 sps:$4 sm:$0xff]   ;;  %v3220_v57 = vld [vmem:[#allocation6 + $0x2dc] ss:$24 sps:$4 sm:$0xff]  }
 0x30d   :  { %v1097_v58 = vrot.slane %v1089_v47, %v3592_v24  ;;  %v1104_v60 = vrot.slane %v1090_v43, %v3592_v24  ;;  %v3223_v47 = vld [vmem:[#allocation6 + $0x5dc] ss:$24 sps:$4 sm:$0xff]   ;;  %v3218_v43 = vld [vmem:[#allocation6 + $0x2d8] ss:$24 sps:$4 sm:$0xff]  }
 0x30f   :  { %v1105_v62 = vcombine.low %v1097_v58, %v1104_v60  ;;  %v3221_v58 = vld [vmem:[#allocation6 + $0x5d8] ss:$24 sps:$4 sm:$0xff]   ;;  %v3226_v60 = vld [vmem:[#allocation6 + $0x2ac] ss:$24 sps:$4 sm:$0xff]  }
 0x311   :  { %v1112_v1 = vrot.slane %v1105_v62, %v3592_v24  ;;  %v3229_v62 = vld [vmem:[#allocation6 + $0x5ac] ss:$24 sps:$4 sm:$0xff]  }
 0x313   :  { %v1114_v3 = vsub.f32 %v189_v63, %v1112_v1  ;;  %v3224_v63 = vld [vmem:[#allocation6 + $0x2a8] ss:$24 sps:$4 sm:$0xff]  }
 0x314   :  { %v3227_v1 = vld [vmem:[#allocation6 + $0x5a8] ss:$24 sps:$4 sm:$0xff]  }
 0x315   :  { %v1123_v8 = vrot.slane %v1114_v3, %v3581_v39  ;;  %v1131_v9 = vrot.slane %v1114_v3, %v3616_v61  ;;  %v1119_v10 = vrot.slane %v1114_v3, %v3575_v37  ;;  %v1127_v11 = vrot.slane %v1114_v3, %v3610_v59  ;;  %v3232_v3 = vld [vmem:[#allocation6 + $0x27c] ss:$24 sps:$4 sm:$0xff]  }
 0x317   :  { %v1137_v14 = vadd.f32 %v1123_v8, %v1078_v6  ;;  %v1139_v15 = vadd.f32 %v1131_v9, %v1080_v0  ;;  %v1136_v24 = vadd.f32 %v1119_v10, %v1077_v2  ;;  %v1138_v16 = vadd.f32 %v1127_v11, %v1079_v7  ;;  %v3235_v6 = vld [vmem:[#allocation6 + $0x57c] ss:$24 sps:$4 sm:$0xff]   ;;  %v3230_v0 = vld [vmem:[#allocation6 + $0x278] ss:$24 sps:$4 sm:$0xff]   ;;  %v3238_v7 = vld [vmem:[#allocation6 + $0x24c] ss:$24 sps:$4 sm:$0xff]  }
 0x318   :  { %v3233_v2 = vld [vmem:[#allocation6 + $0x578] ss:$24 sps:$4 sm:$0xff]   ;;  %v3241_v8 = vld [vmem:[#allocation6 + $0x54c] ss:$24 sps:$4 sm:$0xff]   ;;  %v3236_v9 = vld [vmem:[#allocation6 + $0x248] ss:$24 sps:$4 sm:$0xff]  }
 0x319   :  { %v1141_v17 = vmax.f32 %v1137_v14, 0.0  ;;  %v1143_v12 = vmax.f32 %v1139_v15, 0.0  ;;  %v1140_v18 = vmax.f32 %v1136_v24, 0.0  ;;  %v1142_v13 = vmax.f32 %v1138_v16, 0.0  ;;  %v3239_v10 = vld [vmem:[#allocation6 + $0x548] ss:$24 sps:$4 sm:$0xff]  }
 0x31a   :  { %v3244_v11 = vld [vmem:[#allocation6 + $0x21c] ss:$24 sps:$4 sm:$0xff]   ;;  %v3242_v15 = vld [vmem:[#allocation6 + $0x218] ss:$24 sps:$4 sm:$0xff]   ;;  %v3250_v16 = vld [vmem:[#allocation6 + $0x1ec] ss:$24 sps:$4 sm:$0xff]  }
 0x31b   :  { %v3670_v19 = vpack.c.bf16 %v1141_v17, %v1141_v17  ;;  %v3672_v4 = vpack.c.bf16 %v1143_v12, %v1143_v12  ;;  %v3674_v21 = vpack.c.bf16 %v1140_v18, %v1140_v18  ;;  %v3676_v22 = vpack.c.bf16 %v1142_v13, %v1142_v13  ;;  %v3247_v14 = vld [vmem:[#allocation6 + $0x51c] ss:$24 sps:$4 sm:$0xff]   ;;  %v3245_v24 = vld [vmem:[#allocation6 + $0x518] ss:$24 sps:$4 sm:$0xff]   ;;  %v3253_v17 = vld [vmem:[#allocation6 + $0x4ec] ss:$24 sps:$4 sm:$0xff]  }
 0x31c   :  { %v3248_v12 = vld [vmem:[#allocation6 + $0x1e8] ss:$24 sps:$4 sm:$0xff]   ;;  %v3256_v13 = vld [vmem:[#allocation6 + $0x1bc] ss:$24 sps:$4 sm:$0xff]  }
 0x31d   :  { %2364 = vmatprep.mubr.bf16.mxu0 %v3670_v19  ;;  %2405 = vmatprep.mubr.bf16.mxu1 %v3672_v4  ;;  %v3251_v18 = vld [vmem:[#allocation6 + $0x4e8] ss:$24 sps:$4 sm:$0xff]  }
 0x31e   :  { %2365 = vmatmul.mubr.bf16.vlgmr.msra.gmra.mxu0 %v3674_v21  ;;  %2406 = vmatmul.mubr.bf16.vlgmr.msra.gmra.mxu1 %v3676_v22 }
 0x31f   :  { %2415 = vmatpush1.bf16.msra.mxu0 %v3170_v5  ;;  %2456 = vmatpush1.bf16.msra.mxu1 %v3173_v20  ;;  %v3259_v5 = vld [vmem:[#allocation6 + $0x4bc] ss:$24 sps:$4 sm:$0xff]   ;;  %v3254_v20 = vld [vmem:[#allocation6 + $0x1b8] ss:$24 sps:$4 sm:$0xff]  }
 0x320   :  { %2446 = vmatprep.mubr.bf16.mxu0 %v3670_v19  ;;  %2487 = vmatprep.mubr.bf16.mxu1 %v3672_v4 }
 0x321   :  { %2416 = vmatprep.subr.bf16.mxu0 %v3178_v23  ;;  %2457 = vmatprep.subr.bf16.mxu1 %v3181_v25  ;;  %v3257_v23 = vld [vmem:[#allocation6 + $0x4b8] ss:$24 sps:$4 sm:$0xff]   ;;  %v3262_v25 = vld [vmem:[#allocation6 + $0x18c] ss:$24 sps:$4 sm:$0xff]  }
 0x323   :  { %2417 = vmatpush1.bf16.msra.mxu0 %v3176_v26  ;;  %2458 = vmatpush1.bf16.msra.mxu1 %v3179_v27  ;;  %v3265_v26 = vld [vmem:[#allocation6 + $0x48c] ss:$24 sps:$4 sm:$0xff]   ;;  %v3260_v27 = vld [vmem:[#allocation6 + $0x188] ss:$24 sps:$4 sm:$0xff]  }
 0x324   :  { %2418 = vmatprep.subr.bf16.mxu0 %v3184_v28  ;;  %2459 = vmatprep.subr.bf16.mxu1 %v3187_v29  ;;  %v3263_v28 = vld [vmem:[#allocation6 + $0x488] ss:$24 sps:$4 sm:$0xff]   ;;  %v3268_v29 = vld [vmem:[#allocation6 + $0x164] ss:$24 sps:$4 sm:$0xff]  }
 0x327   :  { %2419 = vmatpush1.bf16.msra.mxu0 %v3182_v30  ;;  %2460 = vmatpush1.bf16.msra.mxu1 %v3185_v31  ;;  %v3271_v30 = vld [vmem:[#allocation6 + $0x464] ss:$24 sps:$4 sm:$0xff]   ;;  %v3266_v31 = vld [vmem:[#allocation6 + $0x160] ss:$24 sps:$4 sm:$0xff]  }
 0x328   :  { %2420 = vmatprep.subr.bf16.mxu0 %v3190_v32  ;;  %2461 = vmatprep.subr.bf16.mxu1 %v3193_v33  ;;  %v3269_v32 = vld [vmem:[#allocation6 + $0x460] ss:$24 sps:$4 sm:$0xff]   ;;  %v3274_v33 = vld [vmem:[#allocation6 + $0x134] ss:$24 sps:$4 sm:$0xff]  }
 0x32b   :  { %2421 = vmatpush1.bf16.msra.mxu0 %v3188_v34  ;;  %2462 = vmatpush1.bf16.msra.mxu1 %v3191_v35  ;;  %v3277_v34 = vld [vmem:[#allocation6 + $0x434] ss:$24 sps:$4 sm:$0xff]   ;;  %v3272_v35 = vld [vmem:[#allocation6 + $0x130] ss:$24 sps:$4 sm:$0xff]  }
 0x32c   :  { %2422 = vmatprep.subr.bf16.mxu0 %v3196_v38  ;;  %2463 = vmatprep.subr.bf16.mxu1 %v3199_v40  ;;  %v3275_v38 = vld [vmem:[#allocation6 + $0x430] ss:$24 sps:$4 sm:$0xff]   ;;  %v3280_v40 = vld [vmem:[#allocation6 + $0x104] ss:$24 sps:$4 sm:$0xff]  }
 0x32f   :  { %2423 = vmatpush1.bf16.msra.mxu0 %v3194_v41  ;;  %2464 = vmatpush1.bf16.msra.mxu1 %v3197_v42  ;;  %v3283_v41 = vld [vmem:[#allocation6 + $0x404] ss:$24 sps:$4 sm:$0xff]   ;;  %v3278_v42 = vld [vmem:[#allocation6 + $0x100] ss:$24 sps:$4 sm:$0xff]  }
 0x330   :  { %2424 = vmatprep.subr.bf16.mxu0 %v3202_v44  ;;  %2465 = vmatprep.subr.bf16.mxu1 %v3205_v45  ;;  %v3281_v44 = vld [vmem:[#allocation6 + $0x400] ss:$24 sps:$4 sm:$0xff]   ;;  %v3286_v45 = vld [vmem:[#allocation6 + $0xd4] ss:$24 sps:$4 sm:$0xff]  }
 0x333   :  { %2425 = vmatpush1.bf16.msra.mxu0 %v3200_v46  ;;  %2466 = vmatpush1.bf16.msra.mxu1 %v3203_v48  ;;  %v3289_v46 = vld [vmem:[#allocation6 + $0x3d4] ss:$24 sps:$4 sm:$0xff]   ;;  %v3284_v48 = vld [vmem:[#allocation6 + $0xd0] ss:$24 sps:$4 sm:$0xff]  }
 0x334   :  { %2426 = vmatprep.subr.bf16.mxu0 %v3208_v49  ;;  %2467 = vmatprep.subr.bf16.mxu1 %v3211_v50  ;;  %v3292_v49 = vld [vmem:[#allocation6 + $0xa4] ss:$24 sps:$4 sm:$0xff]   ;;  %v3290_v50 = vld [vmem:[#allocation6 + $0xa0] ss:$24 sps:$4 sm:$0xff]  }
 0x337   :  { %2427 = vmatpush1.bf16.msra.mxu0 %v3206_v51  ;;  %2468 = vmatpush1.bf16.msra.mxu1 %v3209_v52  ;;  %v3293_v51 = vld [vmem:[#allocation6 + $0x3a0] ss:$24 sps:$4 sm:$0xff]   ;;  %v3298_v52 = vld [vmem:[#allocation6 + $0x74] ss:$24 sps:$4 sm:$0xff]  }
 0x338   :  { %2428 = vmatprep.subr.bf16.mxu0 %v3214_v53  ;;  %2469 = vmatprep.subr.bf16.mxu1 %v3217_v54  ;;  %v3301_v53 = vld [vmem:[#allocation6 + $0x374] ss:$24 sps:$4 sm:$0xff]   ;;  %v3296_v54 = vld [vmem:[#allocation6 + $0x70] ss:$24 sps:$4 sm:$0xff]  }
 0x33b   :  { %2429 = vmatpush1.bf16.msra.mxu0 %v3212_v55  ;;  %2470 = vmatpush1.bf16.msra.mxu1 %v3215_v56  ;;  %v3299_v55 = vld [vmem:[#allocation6 + $0x370] ss:$24 sps:$4 sm:$0xff]   ;;  %v3304_v56 = vld [vmem:[#allocation6 + $0x44] ss:$24 sps:$4 sm:$0xff]  }
 0x33c   :  { %2430 = vmatprep.subr.bf16.mxu0 %v3220_v57  ;;  %2471 = vmatprep.subr.bf16.mxu1 %v3223_v47  ;;  %v3307_v57 = vld [vmem:[#allocation6 + $0x344] ss:$24 sps:$4 sm:$0xff]   ;;  %v3302_v47 = vld [vmem:[#allocation6 + $0x40] ss:$24 sps:$4 sm:$0xff]  }
 0x33f   :  { %2431 = vmatpush2.bf16.msra.mxu0 %v3218_v43  ;;  %2472 = vmatpush2.bf16.msra.mxu1 %v3221_v58  ;;  %v3305_v43 = vld [vmem:[#allocation6 + $0x340] ss:$24 sps:$4 sm:$0xff]   ;;  %v3310_v58 = vld [vmem:[#allocation6 + $0x14] ss:$24 sps:$4 sm:$0xff]  }
 0x340   :  { %2432 = vmatprep.subr.bf16.mxu0 %v3226_v60  ;;  %2473 = vmatprep.subr.bf16.mxu1 %v3229_v62  ;;  %v3313_v60 = vld [vmem:[#allocation6 + $0x314] ss:$24 sps:$4 sm:$0xff]   ;;  %v3308_v62 = vld [vmem:[#allocation6 + $0x10] ss:$24 sps:$4 sm:$0xff]  }
 0x343   :  { %2433 = vmatpush2.bf16.msra.mxu0 %v3224_v63  ;;  %2474 = vmatpush2.bf16.msra.mxu1 %v3227_v1  ;;  %v3311_v63 = vld [vmem:[#allocation6 + $0x310] ss:$24 sps:$4 sm:$0xff]   ;;  %v3316_v1 = vld [vmem:[#allocation6 + $0x2e4] ss:$24 sps:$4 sm:$0xff]  }
 0x344   :  { %2434 = vmatprep.subr.bf16.mxu0 %v3232_v3  ;;  %2475 = vmatprep.subr.bf16.mxu1 %v3235_v6  ;;  %v3319_v3 = vld [vmem:[#allocation6 + $0x5e4] ss:$24 sps:$4 sm:$0xff]   ;;  %v3314_v6 = vld [vmem:[#allocation6 + $0x2e0] ss:$24 sps:$4 sm:$0xff]  }
 0x347   :  { %2435 = vmatpush2.bf16.msra.mxu0 %v3230_v0  ;;  %2476 = vmatpush2.bf16.msra.mxu1 %v3233_v2  ;;  %v3317_v0 = vld [vmem:[#allocation6 + $0x5e0] ss:$24 sps:$4 sm:$0xff]   ;;  %v3322_v2 = vld [vmem:[#allocation6 + $0x2b4] ss:$24 sps:$4 sm:$0xff]  }
 0x348   :  { %2436 = vmatprep.subr.bf16.mxu0 %v3238_v7  ;;  %2477 = vmatprep.subr.bf16.mxu1 %v3241_v8  ;;  %v3325_v7 = vld [vmem:[#allocation6 + $0x5b4] ss:$24 sps:$4 sm:$0xff]   ;;  %v3320_v8 = vld [vmem:[#allocation6 + $0x2b0] ss:$24 sps:$4 sm:$0xff]  }
 0x34b   :  { %2437 = vmatpush2.bf16.msra.mxu0 %v3236_v9  ;;  %2478 = vmatpush2.bf16.msra.mxu1 %v3239_v10  ;;  %v3323_v9 = vld [vmem:[#allocation6 + $0x5b0] ss:$24 sps:$4 sm:$0xff]   ;;  %v3328_v10 = vld [vmem:[#allocation6 + $0x284] ss:$24 sps:$4 sm:$0xff]  }
 0x34c   :  { %2438 = vmatprep.subr.bf16.mxu0 %v3244_v11  ;;  %2479 = vmatprep.subr.bf16.mxu1 %v3247_v14  ;;  %v3331_v11 = vld [vmem:[#allocation6 + $0x584] ss:$24 sps:$4 sm:$0xff]   ;;  %v3326_v14 = vld [vmem:[#allocation6 + $0x280] ss:$24 sps:$4 sm:$0xff]  }
 0x34f   :  { %2439 = vmatpush2.bf16.msra.mxu0 %v3242_v15  ;;  %2480 = vmatpush2.bf16.msra.mxu1 %v3245_v24  ;;  %v3329_v15 = vld [vmem:[#allocation6 + $0x580] ss:$24 sps:$4 sm:$0xff]   ;;  %v3334_v24 = vld [vmem:[#allocation6 + $0x254] ss:$24 sps:$4 sm:$0xff]  }
 0x350   :  { %2440 = vmatprep.subr.bf16.mxu0 %v3250_v16  ;;  %2481 = vmatprep.subr.bf16.mxu1 %v3253_v17  ;;  %v3337_v16 = vld [vmem:[#allocation6 + $0x554] ss:$24 sps:$4 sm:$0xff]   ;;  %v3332_v17 = vld [vmem:[#allocation6 + $0x250] ss:$24 sps:$4 sm:$0xff]  }
 0x353   :  { %2441 = vmatpush2.bf16.msra.mxu0 %v3248_v12  ;;  %2482 = vmatpush2.bf16.msra.mxu1 %v3251_v18  ;;  %v3335_v12 = vld [vmem:[#allocation6 + $0x550] ss:$24 sps:$4 sm:$0xff]   ;;  %v3340_v18 = vld [vmem:[#allocation6 + $0x224] ss:$24 sps:$4 sm:$0xff]  }
 0x354   :  { %2442 = vmatprep.subr.bf16.mxu0 %v3256_v13  ;;  %2483 = vmatprep.subr.bf16.mxu1 %v3259_v5  ;;  %v3343_v13 = vld [vmem:[#allocation6 + $0x524] ss:$24 sps:$4 sm:$0xff]   ;;  %v3338_v5 = vld [vmem:[#allocation6 + $0x220] ss:$24 sps:$4 sm:$0xff]  }
 0x357   :  { %2443 = vmatpush2.bf16.msra.mxu0 %v3254_v20  ;;  %2484 = vmatpush2.bf16.msra.mxu1 %v3257_v23  ;;  %v3341_v20 = vld [vmem:[#allocation6 + $0x520] ss:$24 sps:$4 sm:$0xff]   ;;  %v3346_v23 = vld [vmem:[#allocation6 + $0x1f4] ss:$24 sps:$4 sm:$0xff]  }
 0x358   :  { %2444 = vmatprep.subr.bf16.mxu0 %v3262_v25  ;;  %2485 = vmatprep.subr.bf16.mxu1 %v3265_v26  ;;  %v3349_v25 = vld [vmem:[#allocation6 + $0x4f4] ss:$24 sps:$4 sm:$0xff]   ;;  %v3344_v26 = vld [vmem:[#allocation6 + $0x1f0] ss:$24 sps:$4 sm:$0xff]  }
 0x35b   :  { %2445 = vmatpush2.bf16.msra.mxu0 %v3260_v27  ;;  %2486 = vmatpush2.bf16.msra.mxu1 %v3263_v28  ;;  %v3347_v27 = vld [vmem:[#allocation6 + $0x4f0] ss:$24 sps:$4 sm:$0xff]   ;;  %v3352_v28 = vld [vmem:[#allocation6 + $0x1c4] ss:$24 sps:$4 sm:$0xff]  }
 0x35c   :  { %2496 = vmatprep.subr.bf16.mxu0 %v3268_v29  ;;  %2537 = vmatprep.subr.bf16.mxu1 %v3271_v30  ;;  %v3355_v29 = vld [vmem:[#allocation6 + $0x4c4] ss:$24 sps:$4 sm:$0xff]   ;;  %v3350_v30 = vld [vmem:[#allocation6 + $0x1c0] ss:$24 sps:$4 sm:$0xff]  }
 0x35e   :  { %2447 = vmatmul.mubr.bf16.vlgmr.msra.gmra.mxu0 %v3674_v21  ;;  %2488 = vmatmul.mubr.bf16.vlgmr.msra.gmra.mxu1 %v3676_v22 }
 0x35f   :  { %2497 = vmatpush1.bf16.msra.mxu0 %v3266_v31  ;;  %2528 = vmatprep.mubr.bf16.mxu0 %v3670_v19  ;;  %v3287_v19 = vld [vmem:[#allocation6 + $0x3d0] ss:$24 sps:$4 sm:$0xff]   ;;  %v3353_v31 = vld [vmem:[#allocation6 + $0x4c0] ss:$24 sps:$4 sm:$0xff]  }
 0x360   :  { %2538 = vmatpush1.bf16.msra.mxu1 %v3269_v32  ;;  %2569 = vmatprep.mubr.bf16.mxu1 %v3672_v4  ;;  %v3295_v4 = vld [vmem:[#allocation6 + $0x3a4] ss:$24 sps:$4 sm:$0xff]   ;;  %v3358_v32 = vld [vmem:[#allocation6 + $0x194] ss:$24 sps:$4 sm:$0xff]  }
 0x361   :  { %2498 = vmatprep.subr.bf16.mxu0 %v3274_v33  ;;  %2539 = vmatprep.subr.bf16.mxu1 %v3277_v34  ;;  %v3361_v33 = vld [vmem:[#allocation6 + $0x494] ss:$24 sps:$4 sm:$0xff]   ;;  %v3356_v34 = vld [vmem:[#allocation6 + $0x190] ss:$24 sps:$4 sm:$0xff]  }
 0x363   :  { %2499 = vmatpush1.bf16.msra.mxu0 %v3272_v35  ;;  %v3359_v35 = vld [vmem:[#allocation6 + $0x490] ss:$24 sps:$4 sm:$0xff]  }
 0x364   :  { %2540 = vmatpush1.bf16.msra.mxu1 %v3275_v38  ;;  %2500 = vmatprep.subr.bf16.mxu0 %v3280_v40  ;;  %v1340_v38 = vld [vmem:[%s3720_s12] sm:$0x3f] }
 0x365   :  { %2541 = vmatprep.subr.bf16.mxu1 %v3283_v41  ;;  %v1345_v40 = vrot.slane %v1340_v38, %v3575_v37  ;;  %v1349_v41 = vrot.slane %v1340_v38, %v3581_v39  ;;  %v1353_v37 = vrot.slane %v1340_v38, %v3610_v59  ;;  %v1357_v39 = vrot.slane %v1340_v38, %v3616_v61 }
 0x366   :  { %v1360_v59 = vsub.s32 4, %v3572_v36  ;;  %v1364_v61 = vsub.s32 5, %v3572_v36 }
 0x367   :  { %2501 = vmatpush1.bf16.msra.mxu0 %v3278_v42 }
 0x368   :  { %2542 = vmatpush1.bf16.msra.mxu1 %v3281_v44  ;;  %2502 = vmatprep.subr.bf16.mxu0 %v3286_v45 }
 0x369   :  { %2543 = vmatprep.subr.bf16.mxu1 %v3289_v46 }
 0x36b   :  { %2503 = vmatpush1.bf16.msra.mxu0 %v3284_v48 }
 0x36c   :  { %2544 = vmatpush1.bf16.msra.mxu1 %v3287_v19  ;;  %2504 = vmatprep.subr.bf16.mxu0 %v3292_v49 }
 0x36d   :  { %2545 = vmatprep.subr.bf16.mxu1 %v3295_v4 }
 0x36f   :  { %2505 = vmatpush1.bf16.msra.mxu0 %v3290_v50 }
 0x370   :  { %2546 = vmatpush1.bf16.msra.mxu1 %v3293_v51  ;;  %2506 = vmatprep.subr.bf16.mxu0 %v3298_v52 }
 0x371   :  { %2547 = vmatprep.subr.bf16.mxu1 %v3301_v53 }
 0x373   :  { %2507 = vmatpush1.bf16.msra.mxu0 %v3296_v54 }
 0x374   :  { %2548 = vmatpush1.bf16.msra.mxu1 %v3299_v55  ;;  %2508 = vmatprep.subr.bf16.mxu0 %v3304_v56 }
 0x375   :  { %2549 = vmatprep.subr.bf16.mxu1 %v3307_v57 }
 0x377   :  { %2509 = vmatpush1.bf16.msra.mxu0 %v3302_v47 }
 0x378   :  { %2550 = vmatpush1.bf16.msra.mxu1 %v3305_v43  ;;  %2510 = vmatprep.subr.bf16.mxu0 %v3310_v58 }
 0x379   :  { %2551 = vmatprep.subr.bf16.mxu1 %v3313_v60 }
 0x37b   :  { %2511 = vmatpush1.bf16.msra.mxu0 %v3308_v62 }
 0x37c   :  { %2552 = vmatpush1.bf16.msra.mxu1 %v3311_v63  ;;  %2512 = vmatprep.subr.bf16.mxu0 %v3316_v1 }
 0x37d   :  { %2553 = vmatprep.subr.bf16.mxu1 %v3319_v3 }
 0x37f   :  { %2513 = vmatpush2.bf16.msra.mxu0 %v3314_v6 }
 0x380   :  { %2554 = vmatpush2.bf16.msra.mxu1 %v3317_v0  ;;  %2514 = vmatprep.subr.bf16.mxu0 %v3322_v2 }
 0x381   :  { %2555 = vmatprep.subr.bf16.mxu1 %v3325_v7 }
 0x383   :  { %2515 = vmatpush2.bf16.msra.mxu0 %v3320_v8  ;;  %v1361_v8 = vrot.slane %v1340_v38, %v1360_v59 }
 0x384   :  { %2556 = vmatpush2.bf16.msra.mxu1 %v3323_v9  ;;  %2516 = vmatprep.subr.bf16.mxu0 %v3328_v10  ;;  %v1365_v9 = vrot.slane %v1340_v38, %v1364_v61 }
 0x385   :  { %2557 = vmatprep.subr.bf16.mxu1 %v3331_v11 }
 0x387   :  { %2517 = vmatpush2.bf16.msra.mxu0 %v3326_v14 }
 0x388   :  { %2558 = vmatpush2.bf16.msra.mxu1 %v3329_v15  ;;  %2518 = vmatprep.subr.bf16.mxu0 %v3334_v24 }
 0x389   :  { %2559 = vmatprep.subr.bf16.mxu1 %v3337_v16 }
 0x38b   :  { %2519 = vmatpush2.bf16.msra.mxu0 %v3332_v17 }
 0x38c   :  { %2560 = vmatpush2.bf16.msra.mxu1 %v3335_v12  ;;  %2520 = vmatprep.subr.bf16.mxu0 %v3340_v18 }
 0x38d   :  { %2561 = vmatprep.subr.bf16.mxu1 %v3343_v13 }
 0x38f   :  { %2521 = vmatpush2.bf16.msra.mxu0 %v3338_v5 }
 0x390   :  { %2562 = vmatpush2.bf16.msra.mxu1 %v3341_v20  ;;  %2522 = vmatprep.subr.bf16.mxu0 %v3346_v23 }
 0x391   :  { %2563 = vmatprep.subr.bf16.mxu1 %v3349_v25 }
 0x393   :  { %2523 = vmatpush2.bf16.msra.mxu0 %v3344_v26 }
 0x394   :  { %2564 = vmatpush2.bf16.msra.mxu1 %v3347_v27  ;;  %2524 = vmatprep.subr.bf16.mxu0 %v3352_v28 }
 0x395   :  { %2565 = vmatprep.subr.bf16.mxu1 %v3355_v29 }
 0x397   :  { %2525 = vmatpush2.bf16.msra.mxu0 %v3350_v30 }
 0x398   :  { %2566 = vmatpush2.bf16.msra.mxu1 %v3353_v31  ;;  %2526 = vmatprep.subr.bf16.mxu0 %v3358_v32 }
 0x399   :  { %2567 = vmatprep.subr.bf16.mxu1 %v3361_v33 }
 0x39b   :  { %2527 = vmatpush2.bf16.msra.mxu0 %v3356_v34 }
 0x39c   :  { %2568 = vmatpush2.bf16.msra.mxu1 %v3359_v35 }
 0x39e   :  { %2529 = vmatmul.mubr.bf16.vlgmr.msra.gmra.mxu0 %v3674_v21 }
 0x39f   :  { %2570 = vmatmul.mubr.bf16.vlgmr.msra.gmra.mxu1 %v3676_v22 }
 0x3de   :  { %v2366_v42 = vpop.f32.mrf.mxu0  ;;  %v2407_v44 = vpop.f32.mrf.mxu1 }
 0x3df   :  { %v2367_v45 = vadd.f32 %v2366_v42, %v1345_v40 }
 0x3e0   :  { %v2368_v46 = vpop.f32.mrf.mxu0  ;;  %v2409_v48 = vpop.f32.mrf.mxu1 }
 0x3e1   :  { %v2408_v19 = vadd.f32 %v2407_v44, %v2367_v45  ;;  %v2369_v49 = vadd.f32 %v2368_v46, %v1349_v41 }
 0x3e2   :  { %v2370_v4 = vpop.f32.mrf.mxu0  ;;  %v2411_v50 = vpop.f32.mrf.mxu1 }
 0x3e3   :  { %v2410_v21 = vadd.f32 %v2409_v48, %v2369_v49  ;;  %3374 = vtanh.f32 %v2408_v19 }
 0x3e4   :  { %v2371_v22 = vpop.f32.mrf.mxu0  ;;  %v2412_v51 = vpop.f32.mrf.mxu1 }
 0x3e5   :  { %3376 = vtanh.f32 %v2410_v21 }
 0x3f0   :  { %v3375_v52 = vpop.eup %3374 }
 0x3f2   :  { %v3377_v53 = vpop.eup %3376 }
 0x3f3   :  { %v2901_v54 = vpack.c.bf16 %v3377_v53, %v3375_v52 }
 0x3f5   :  { %2608 = vst [vmem:[%s3721_s13] sm:$0xff] %v2901_v54 }
 0x41e   :  { %v2448_v55 = vpop.f32.mrf.mxu0  ;;  %v2489_v56 = vpop.f32.mrf.mxu1 }
 0x41f   :  { %v2449_v57 = vadd.f32 %v2448_v55, %v1353_v37 }
 0x420   :  { %v2450_v47 = vpop.f32.mrf.mxu0  ;;  %v2491_v43 = vpop.f32.mrf.mxu1 }
 0x421   :  { %v2490_v58 = vadd.f32 %v2489_v56, %v2449_v57  ;;  %v2451_v60 = vadd.f32 %v2450_v47, %v1357_v39 }
 0x422   :  { %v2452_v62 = vpop.f32.mrf.mxu0  ;;  %v2493_v63 = vpop.f32.mrf.mxu1 }
 0x423   :  { %v2492_v1 = vadd.f32 %v2491_v43, %v2451_v60  ;;  %3378 = vtanh.f32 %v2490_v58 }
 0x424   :  { %v2453_v3 = vpop.f32.mrf.mxu0  ;;  %v2494_v6 = vpop.f32.mrf.mxu1 }
 0x425   :  { %3380 = vtanh.f32 %v2492_v1 }
 0x430   :  { %v3379_v0 = vpop.eup %3378 }
 0x432   :  { %v3381_v2 = vpop.eup %3380 }
 0x433   :  { %v2902_v7 = vpack.c.bf16 %v3381_v2, %v3379_v0 }
 0x435   :  { %2609 = vst [vmem:[%s3721_s13 + $0x8] sm:$0xff] %v2902_v7 }
 0x45e   :  { %v2530_v10 = vpop.f32.mrf.mxu0 }
 0x45f   :  { %v2531_v11 = vadd.f32 %v2530_v10, %v1361_v8  ;;  %v2571_v14 = vpop.f32.mrf.mxu1 }
 0x460   :  { %v2532_v15 = vpop.f32.mrf.mxu0 }
 0x461   :  { %v2572_v24 = vadd.f32 %v2571_v14, %v2531_v11  ;;  %v2533_v16 = vadd.f32 %v2532_v15, %v1365_v9  ;;  %v2573_v17 = vpop.f32.mrf.mxu1 }
 0x462   :  { %v2534_v12 = vpop.f32.mrf.mxu0 }
 0x463   :  { %v2574_v18 = vadd.f32 %v2573_v17, %v2533_v16  ;;  %v2575_v13 = vpop.f32.mrf.mxu1  ;;  %3382 = vtanh.f32 %v2572_v24 }
 0x464   :  { %v2535_v5 = vpop.f32.mrf.mxu0 }
 0x465   :  { %3384 = vtanh.f32 %v2574_v18  ;;  %v2576_v20 = vpop.f32.mrf.mxu1 }
 0x470   :  { %v3383_v23 = vpop.eup %3382 }
 0x472   :  { %v3385_v25 = vpop.eup %3384 }
 0x473   :  { %v2903_v26 = vpack.c.bf16 %v3385_v25, %v3383_v23 }
 0x475   :  { %2610 = vst [vmem:[%s3721_s13 + $0x10] sm:$0xff] %v2903_v26 }
 0x476   :  { %2615 = vsyncpa [#allocation3], 1 }
 0x477   :  { %2616 = vsyncpa [#allocation5], 1 }

</bundles_post_ra>
